<compile_context>
chip_gen: v6e
topology: v6e:2x2x1
jax: 0.10.0
libtpu: 0.0.40
codegen_flags: <defaults>
</compile_context>

<pallas_src>
import functools

import jax
import jax.numpy as jnp
from jax import lax
from jax.experimental import pallas as pl
from jax.experimental.pallas import tpu as pltpu

LANE = 128     # one vreg lane width; per-gate / per-block lane padding
TC_MAX = 256   # max timesteps per grid chunk (x_proj tile 4 MiB @ 256, double-buffered)


def lstm_chunk_kernel(xp_ref, hc0_ref, whh_ref, h_seq_ref, hc_ref,
                      h_scr, c_scr, *, unroll):
    """One grid step == one chunk of Tc timesteps of the LSTM recurrence.

    xp_ref    : (Tc, B, 512)  x_t @ W_ih^T + (b_ih+b_hh), per-gate 128-lane blocks (streamed)
    hc0_ref   : (B, 256)      packed [h0 | c0], lane-padded                        (resident)
    whh_ref   : (128, 512)    W_hh^T, per-gate 128-lane blocks                     (resident)
    h_seq_ref : (Tc, B, 128)  h_t for every timestep of the chunk                  (streamed)
    hc_ref    : (B, 256)      packed final [clip(h_T) | c_T], written on last chunk
    h_scr     : (B, 128)      hidden-state carry across chunks (VMEM scratch)
    c_scr     : (B, 128)      cell-state carry across chunks (VMEM scratch)
    """
    c_idx = pl.program_id(0)
    tc = xp_ref.shape[0]
    P = LANE

    @pl.when(c_idx == 0)
    def _init():
        h_scr[...] = hc0_ref[:, 0:P]
        c_scr[...] = hc0_ref[:, P:2 * P]

    def step(t, carry):
        h, c = carry
        # Serial-path work per step: one K=128 MXU matmul + elementwise gates.
        gates = xp_ref[t] + jnp.dot(h, whh_ref[...],
                                    preferred_element_type=jnp.float32)
        i_g = jax.nn.sigmoid(gates[:, 0 * P:1 * P])
        f_g = jax.nn.sigmoid(gates[:, 1 * P:2 * P])
        g_g = jnp.tanh(gates[:, 2 * P:3 * P])
        o_g = jax.nn.sigmoid(gates[:, 3 * P:4 * P])
        # Padded lanes stay exactly zero: 0.5*0 + 0.5*tanh(0) = 0.
        c_new = f_g * c + i_g * g_g
        h_new = o_g * jnp.tanh(c_new)
        h_seq_ref[t] = h_new              # single full-vreg store per step
        return h_new, c_new

    h_fin, c_fin = lax.fori_loop(0, tc, step, (h_scr[...], c_scr[...]),
                                 unroll=unroll)

    # Carry state to the next chunk.
    h_scr[...] = h_fin
    c_scr[...] = c_fin

    @pl.when(c_idx == pl.num_programs(0) - 1)
    def _final():
        # Reference clamps only the RETURNED controller h state (no-op for tanh-bounded h).
        hc_ref[:, 0:P] = jnp.clip(h_fin, -20.0, 20.0)
        hc_ref[:, P:2 * P] = c_fin


@jax.jit
def ntm_forward_seq(x_seq, h0, c0, w_ih, w_hh, b_ih, b_hh, w_out, b_out):
    """Runs T NTM timesteps: Pallas kernel for the serial recurrence, batched XLA
    matmuls for the (recurrence-independent) input projection and output head.

    Weights use PyTorch convention (out_features, in_features).
    Returns (out_seq (T,B,O), h_T (B,H), c_T (B,H)). T=1 recovers single-step forward.
    """
    T, B, In = x_seq.shape
    H = h0.shape[1]
    O = w_out.shape[0]
    P = LANE
    f32 = jnp.float32
    hi = jax.lax.Precision.HIGHEST
    assert In <= P and H <= P and O <= P, "padded layout assumes In, H, O <= 128"

    Bp = max(8, -(-B // 8) * 8)                 # pad batch to a full 8-sublane vreg

    # Largest chunk size dividing T (amortize grid overhead; bounded by VMEM budget).
    tc = 1
    for d in range(1, min(T, TC_MAX) + 1):
        if T % d == 0:
            tc = d
    n_chunks = T // tc
    unroll = tc if tc <= 16 else 8              # let LLO overlap step tails/heads

    # --- parameter packing: one zero-padded 128-lane block per gate (order i,f,g,o) ---
    w_ih_g = w_ih.astype(f32).reshape(4, H, In)
    w_hh_g = w_hh.astype(f32).reshape(4, H, H)
    b_g = (b_ih + b_hh).astype(f32).reshape(4, H)

    w_ih_p = jnp.zeros((In, 4 * P), f32)
    w_hh_p = jnp.zeros((P, 4 * P), f32)
    b_p = jnp.zeros((1, 4 * P), f32)
    for g in range(4):
        w_ih_p = w_ih_p.at[:, g * P:g * P + H].set(w_ih_g[g].T)
        w_hh_p = w_hh_p.at[:H, g * P:g * P + H].set(w_hh_g[g].T)
        b_p = b_p.at[0, g * P:g * P + H].set(b_g[g])

    # --- batch padding (padded rows are numerically inert, sliced off afterwards) ---
    x_b = jnp.pad(x_seq.astype(f32), ((0, 0), (0, Bp - B), (0, 0)))
    h0_b = jnp.pad(h0.astype(f32), ((0, Bp - B), (0, 0)))
    c0_b = jnp.pad(c0.astype(f32), ((0, Bp - B), (0, 0)))

    # --- hoisted input projection: one MXU-friendly (T*Bp, In) @ (In, 512) matmul ---
    x_proj = (jnp.dot(x_b.reshape(T * Bp, In), w_ih_p, precision=hi)
              .reshape(T, Bp, 4 * P) + b_p)

    hc0 = (jnp.zeros((Bp, 2 * P), f32)
           .at[:, :H].set(h0_b)
           .at[:, P:P + H].set(c0_b))

    cost = pl.CostEstimate(
        flops=2 * T * Bp * P * (4 * P),
        transcendentals=5 * T * Bp * P,
        bytes_accessed=4 * (T * Bp * 4 * P + T * Bp * P + 2 * Bp * 2 * P + P * 4 * P),
    )

    def resident(shape):
        return pl.BlockSpec(shape, lambda c: (0,) * len(shape))

    h_seq, hc = pl.pallas_call(
        functools.partial(lstm_chunk_kernel, unroll=unroll),
        out_shape=(jax.ShapeDtypeStruct((T, Bp, P), f32),
                   jax.ShapeDtypeStruct((Bp, 2 * P), f32)),
        grid_spec=pltpu.PrefetchScalarGridSpec(
            num_scalar_prefetch=0,
            grid=(n_chunks,),
            in_specs=[
                pl.BlockSpec((tc, Bp, 4 * P), lambda c: (c, 0, 0)),  # x_proj (streamed)
                resident((Bp, 2 * P)),                               # packed [h0|c0]
                resident((P, 4 * P)),                                # W_hh^T (per-gate blocks)
            ],
            out_specs=(
                pl.BlockSpec((tc, Bp, P), lambda c: (c, 0, 0)),      # h_t (streamed)
                resident((Bp, 2 * P)),                               # packed final [h|c]
            ),
            scratch_shapes=[pltpu.VMEM((Bp, P), f32),                # h carry
                            pltpu.VMEM((Bp, P), f32)],               # c carry
        ),
        input_output_aliases={1: 1},           # reuse hc0 buffer for the final [h|c]
        compiler_params=pltpu.CompilerParams(
            dimension_semantics=("arbitrary",),    # recurrence -> sequential grid
            vmem_limit_bytes=32 * 1024 * 1024),
        cost_estimate=cost,
    )(x_proj, hc0, w_hh_p)

    # --- output head off the serial path: one batched matmul + sigmoid over T*B rows ---
    h_valid = h_seq[:, :B, :H]
    logits = jnp.dot(h_valid.reshape(T * B, H), w_out.astype(f32).T, precision=hi)
    out_seq = jax.nn.sigmoid(logits + b_out.astype(f32)).reshape(T, B, O)

    h_final = hc[:B, :H]          # already clipped in the kernel
    c_final = hc[:B, P:P + H]
    return out_seq, h_final, c_final


def ntm_forward_ref(x_seq, h0, c0, w_ih, w_hh, b_ih, b_hh, w_out, b_out):
    """Pure-JAX reference of the unrolled PyTorch forward."""
    H = h0.shape[1]
    hi = jax.lax.Precision.HIGHEST
    h, c = h0, c0
    outs = []
    for t in range(x_seq.shape[0]):
        gates = (jnp.dot(x_seq[t], w_ih.T, precision=hi) + b_ih
                 + jnp.dot(h, w_hh.T, precision=hi) + b_hh)
        i_g = jax.nn.sigmoid(gates[:, :H])
        f_g = jax.nn.sigmoid(gates[:, H:2 * H])
        g_g = jnp.tanh(gates[:, 2 * H:3 * H])
        o_g = jax.nn.sigmoid(gates[:, 3 * H:])
        c = f_g * c + i_g * g_g
        h = o_g * jnp.tanh(c)
        outs.append(jax.nn.sigmoid(jnp.dot(h, w_out.T, precision=hi) + b_out))
    return jnp.stack(outs), jnp.clip(h, -20.0, 20.0), c


if __name__ == "__main__":
    # Small shapes consistent with the module's forward (heads disabled).
    seq_len = 8
    batch = 2
    input_size = 8
    controller_size = 32   # H
    output_size = 8

    key = jax.random.PRNGKey(0)
    k = jax.random.split(key, 8)

    lstm_bound = 1.0 / jnp.sqrt(controller_size)
    w_ih = jax.random.uniform(k[0], (4 * controller_size, input_size),
                              minval=-lstm_bound, maxval=lstm_bound, dtype=jnp.float32)
    w_hh = jax.random.uniform(k[1], (4 * controller_size, controller_size),
                              minval=-lstm_bound, maxval=lstm_bound, dtype=jnp.float32)
    b_ih = jax.random.uniform(k[2], (4 * controller_size,),
                              minval=-lstm_bound, maxval=lstm_bound, dtype=jnp.float32)
    b_hh = jax.random.uniform(k[3], (4 * controller_size,),
                              minval=-lstm_bound, maxval=lstm_bound, dtype=jnp.float32)
    w_out = jax.random.uniform(k[4], (output_size, controller_size),
                               minval=-lstm_bound, maxval=lstm_bound, dtype=jnp.float32)
    b_out = jax.random.uniform(k[5], (output_size,),
                               minval=-lstm_bound, maxval=lstm_bound, dtype=jnp.float32)

    # Inputs. reset(batch_size) zeroes the controller h/c state.
    x_seq = jax.random.normal(k[6], (seq_len, batch, input_size), dtype=jnp.float32)
    h0 = jnp.zeros((batch, controller_size), dtype=jnp.float32)
    c0 = jnp.zeros((batch, controller_size), dtype=jnp.float32)

    out, h1, c1 = ntm_forward_seq(x_seq, h0, c0, w_ih, w_hh, b_ih, b_hh, w_out, b_out)
    jax.block_until_ready((out, h1, c1))

    out_r, h_r, c_r = ntm_forward_ref(x_seq, h0, c0, w_ih, w_hh, b_ih, b_hh, w_out, b_out)
    assert jnp.allclose(out, out_r, atol=1e-4), "output sequence mismatch vs reference"
    assert jnp.allclose(h1, h_r, atol=1e-4), "h state mismatch vs reference"
    assert jnp.allclose(c1, c_r, atol=1e-4), "c state mismatch vs reference"

    # TODO(synk): memory heads / softmax branch are disabled in the source module
    # (softmax=False default, heads commented out), so they are not implemented.
    print("KERNEL_OK")
</pallas_src>

<mosaic_0001>
module attributes {stable_mosaic.version = 11 : i64} {
  func.func @lstm_chunk_kernel(%arg0: i32, %arg1: memref<8x8x512xf32, #tpu.memory_space<vmem>>, %arg2: memref<8x256xf32, #tpu.memory_space<vmem>>, %arg3: memref<128x512xf32, #tpu.memory_space<vmem>>, %arg4: memref<8x8x128xf32, #tpu.memory_space<vmem>>, %arg5: memref<8x256xf32, #tpu.memory_space<vmem>>, %arg6: memref<8x128xf32, #tpu.memory_space<vmem>>, %arg7: memref<8x128xf32, #tpu.memory_space<vmem>>) attributes {dimension_semantics = [#tpu.dimension_semantics<arbitrary>], iteration_bounds = array<i64: 1>, scalar_prefetch = 0 : i64, scratch_operands = 2 : i64, tpu.core_type = #tpu.core_type<tc>, window_params = [{transform_indices = @transform_0, window_bounds = array<i64: 8, 8, 512>}, {pipeline_mode = #tpu.pipeline_mode<synchronous>, transform_indices = @transform_1, window_bounds = array<i64: 8, 256>}, {pipeline_mode = #tpu.pipeline_mode<synchronous>, transform_indices = @transform_2, window_bounds = array<i64: 128, 512>}, {transform_indices = @transform_3, window_bounds = array<i64: 8, 8, 128>}, {pipeline_mode = #tpu.pipeline_mode<synchronous>, transform_indices = @transform_4, window_bounds = array<i64: 8, 256>}]} {
    %c0_i32 = arith.constant 0 : i32
    %0 = arith.cmpi eq, %arg0, %c0_i32 : i32
    %1 = arith.extui %0 : i1 to i32
    %c0_i32_0 = arith.constant 0 : i32
    %2 = arith.cmpi ne, %1, %c0_i32_0 : i32
    scf.if %2 {
      %c0_90 = arith.constant 0 : index
      %c0_91 = arith.constant 0 : index
      %290 = vector.load %arg2[%c0_90, %c0_91] : memref<8x256xf32, #tpu.memory_space<vmem>>, vector<8x128xf32>
      %c0_92 = arith.constant 0 : index
      %c0_93 = arith.constant 0 : index
      %291 = vector.load %arg6[%c0_92, %c0_93] : memref<8x128xf32, #tpu.memory_space<vmem>>, vector<8x128xf32>
      tpu.vector_store %arg6[%c0_92, %c0_93], %290 {strides = array<i32>} : memref<8x128xf32, #tpu.memory_space<vmem>>, vector<8x128xf32>,
      %c0_94 = arith.constant 0 : index
      %c128 = arith.constant 128 : index
      %292 = vector.load %arg2[%c0_94, %c128] : memref<8x256xf32, #tpu.memory_space<vmem>>, vector<8x128xf32>
      %c0_95 = arith.constant 0 : index
      %c0_96 = arith.constant 0 : index
      %293 = vector.load %arg7[%c0_95, %c0_96] : memref<8x128xf32, #tpu.memory_space<vmem>>, vector<8x128xf32>
      tpu.vector_store %arg7[%c0_95, %c0_96], %292 {strides = array<i32>} : memref<8x128xf32, #tpu.memory_space<vmem>>, vector<8x128xf32>,
    } else {
    }
    %c0 = arith.constant 0 : index
    %c0_1 = arith.constant 0 : index
    %3 = vector.load %arg6[%c0, %c0_1] : memref<8x128xf32, #tpu.memory_space<vmem>>, vector<8x128xf32>
    %c0_2 = arith.constant 0 : index
    %c0_3 = arith.constant 0 : index
    %4 = vector.load %arg7[%c0_2, %c0_3] : memref<8x128xf32, #tpu.memory_space<vmem>>, vector<8x128xf32>
    %c0_i32_4 = arith.constant 0 : i32
    %5 = arith.index_cast %c0_i32_4 : i32 to index
    %c0_5 = arith.constant 0 : index
    %c0_6 = arith.constant 0 : index
    %6 = vector.load %arg1[%5, %c0_5, %c0_6] : memref<8x8x512xf32, #tpu.memory_space<vmem>>, vector<1x8x512xf32>
    %7 = vector.shape_cast %6 : vector<1x8x512xf32> to vector<8x512xf32>
    %c0_7 = arith.constant 0 : index
    %c0_8 = arith.constant 0 : index
    %8 = vector.load %arg3[%c0_7, %c0_8] : memref<128x512xf32, #tpu.memory_space<vmem>>, vector<128x512xf32>
    %cst = arith.constant dense<0.000000e+00> : vector<8x512xf32>
    %9 = tpu.matmul %3, %8, %cst {dimension_numbers = #tpu.dot_dimension_numbers<[1], [0], [0], [1], [0, 0, 1, 1], [], []>} : vector<8x128xf32>, vector<128x512xf32>, vector<8x512xf32> -> vector<8x512xf32>
    %10 = arith.addf %7, %9 : vector<8x512xf32>
    %11 = vector.extract_strided_slice %10 {offsets = [0, 0], sizes = [8, 128], strides = [1, 1]} : vector<8x512xf32> to vector<8x128xf32>
    %12 = arith.negf %11 : vector<8x128xf32>
    %13 = math.exp %12 : vector<8x128xf32>
    %cst_9 = arith.constant 1.000000e+00 : f32
    %14 = vector.broadcast %cst_9 : f32 to vector<8x128xf32>
    %15 = arith.addf %14, %13 : vector<8x128xf32>
    %16 = arith.divf %14, %15 : vector<8x128xf32>
    %17 = vector.extract_strided_slice %10 {offsets = [0, 128], sizes = [8, 128], strides = [1, 1]} : vector<8x512xf32> to vector<8x128xf32>
    %18 = arith.negf %17 : vector<8x128xf32>
    %19 = math.exp %18 : vector<8x128xf32>
    %cst_10 = arith.constant 1.000000e+00 : f32
    %20 = vector.broadcast %cst_10 : f32 to vector<8x128xf32>
    %21 = arith.addf %20, %19 : vector<8x128xf32>
    %22 = arith.divf %20, %21 : vector<8x128xf32>
    %23 = vector.extract_strided_slice %10 {offsets = [0, 256], sizes = [8, 128], strides = [1, 1]} : vector<8x512xf32> to vector<8x128xf32>
    %24 = math.tanh %23 : vector<8x128xf32>
    %25 = vector.extract_strided_slice %10 {offsets = [0, 384], sizes = [8, 128], strides = [1, 1]} : vector<8x512xf32> to vector<8x128xf32>
    %26 = arith.negf %25 : vector<8x128xf32>
    %27 = math.exp %26 : vector<8x128xf32>
    %cst_11 = arith.constant 1.000000e+00 : f32
    %28 = vector.broadcast %cst_11 : f32 to vector<8x128xf32>
    %29 = arith.addf %28, %27 : vector<8x128xf32>
    %30 = arith.divf %28, %29 : vector<8x128xf32>
    %31 = arith.mulf %22, %4 : vector<8x128xf32>
    %32 = arith.mulf %16, %24 : vector<8x128xf32>
    %33 = arith.addf %31, %32 : vector<8x128xf32>
    %34 = math.tanh %33 : vector<8x128xf32>
    %35 = arith.mulf %30, %34 : vector<8x128xf32>
    %36 = arith.index_cast %c0_i32_4 : i32 to index
    %c0_12 = arith.constant 0 : index
    %c0_13 = arith.constant 0 : index
    %37 = vector.load %arg4[%36, %c0_12, %c0_13] : memref<8x8x128xf32, #tpu.memory_space<vmem>>, vector<1x8x128xf32>
    %38 = vector.shape_cast %37 : vector<1x8x128xf32> to vector<8x128xf32>
    %39 = vector.shape_cast %35 : vector<8x128xf32> to vector<1x8x128xf32>
    tpu.vector_store %arg4[%36, %c0_12, %c0_13], %39 {strides = array<i32>} : memref<8x8x128xf32, #tpu.memory_space<vmem>>, vector<1x8x128xf32>,
    %c1_i32 = arith.constant 1 : i32
    %40 = arith.index_cast %c1_i32 : i32 to index
    %c0_14 = arith.constant 0 : index
    %c0_15 = arith.constant 0 : index
    %41 = vector.load %arg1[%40, %c0_14, %c0_15] : memref<8x8x512xf32, #tpu.memory_space<vmem>>, vector<1x8x512xf32>
    %42 = vector.shape_cast %41 : vector<1x8x512xf32> to vector<8x512xf32>
    %c0_16 = arith.constant 0 : index
    %c0_17 = arith.constant 0 : index
    %43 = vector.load %arg3[%c0_16, %c0_17] : memref<128x512xf32, #tpu.memory_space<vmem>>, vector<128x512xf32>
    %cst_18 = arith.constant dense<0.000000e+00> : vector<8x512xf32>
    %44 = tpu.matmul %35, %43, %cst_18 {dimension_numbers = #tpu.dot_dimension_numbers<[1], [0], [0], [1], [0, 0, 1, 1], [], []>} : vector<8x128xf32>, vector<128x512xf32>, vector<8x512xf32> -> vector<8x512xf32>
    %45 = arith.addf %42, %44 : vector<8x512xf32>
    %46 = vector.extract_strided_slice %45 {offsets = [0, 0], sizes = [8, 128], strides = [1, 1]} : vector<8x512xf32> to vector<8x128xf32>
    %47 = arith.negf %46 : vector<8x128xf32>
    %48 = math.exp %47 : vector<8x128xf32>
    %cst_19 = arith.constant 1.000000e+00 : f32
    %49 = vector.broadcast %cst_19 : f32 to vector<8x128xf32>
    %50 = arith.addf %49, %48 : vector<8x128xf32>
    %51 = arith.divf %49, %50 : vector<8x128xf32>
    %52 = vector.extract_strided_slice %45 {offsets = [0, 128], sizes = [8, 128], strides = [1, 1]} : vector<8x512xf32> to vector<8x128xf32>
    %53 = arith.negf %52 : vector<8x128xf32>
    %54 = math.exp %53 : vector<8x128xf32>
    %cst_20 = arith.constant 1.000000e+00 : f32
    %55 = vector.broadcast %cst_20 : f32 to vector<8x128xf32>
    %56 = arith.addf %55, %54 : vector<8x128xf32>
    %57 = arith.divf %55, %56 : vector<8x128xf32>
    %58 = vector.extract_strided_slice %45 {offsets = [0, 256], sizes = [8, 128], strides = [1, 1]} : vector<8x512xf32> to vector<8x128xf32>
    %59 = math.tanh %58 : vector<8x128xf32>
    %60 = vector.extract_strided_slice %45 {offsets = [0, 384], sizes = [8, 128], strides = [1, 1]} : vector<8x512xf32> to vector<8x128xf32>
    %61 = arith.negf %60 : vector<8x128xf32>
    %62 = math.exp %61 : vector<8x128xf32>
    %cst_21 = arith.constant 1.000000e+00 : f32
    %63 = vector.broadcast %cst_21 : f32 to vector<8x128xf32>
    %64 = arith.addf %63, %62 : vector<8x128xf32>
    %65 = arith.divf %63, %64 : vector<8x128xf32>
    %66 = arith.mulf %57, %33 : vector<8x128xf32>
    %67 = arith.mulf %51, %59 : vector<8x128xf32>
    %68 = arith.addf %66, %67 : vector<8x128xf32>
    %69 = math.tanh %68 : vector<8x128xf32>
    %70 = arith.mulf %65, %69 : vector<8x128xf32>
    %71 = arith.index_cast %c1_i32 : i32 to index
    %c0_22 = arith.constant 0 : index
    %c0_23 = arith.constant 0 : index
    %72 = vector.load %arg4[%71, %c0_22, %c0_23] : memref<8x8x128xf32, #tpu.memory_space<vmem>>, vector<1x8x128xf32>
    %73 = vector.shape_cast %72 : vector<1x8x128xf32> to vector<8x128xf32>
    %74 = vector.shape_cast %70 : vector<8x128xf32> to vector<1x8x128xf32>
    tpu.vector_store %arg4[%71, %c0_22, %c0_23], %74 {strides = array<i32>} : memref<8x8x128xf32, #tpu.memory_space<vmem>>, vector<1x8x128xf32>,
    %c2_i32 = arith.constant 2 : i32
    %75 = arith.index_cast %c2_i32 : i32 to index
    %c0_24 = arith.constant 0 : index
    %c0_25 = arith.constant 0 : index
    %76 = vector.load %arg1[%75, %c0_24, %c0_25] : memref<8x8x512xf32, #tpu.memory_space<vmem>>, vector<1x8x512xf32>
    %77 = vector.shape_cast %76 : vector<1x8x512xf32> to vector<8x512xf32>
    %c0_26 = arith.constant 0 : index
    %c0_27 = arith.constant 0 : index
    %78 = vector.load %arg3[%c0_26, %c0_27] : memref<128x512xf32, #tpu.memory_space<vmem>>, vector<128x512xf32>
    %cst_28 = arith.constant dense<0.000000e+00> : vector<8x512xf32>
    %79 = tpu.matmul %70, %78, %cst_28 {dimension_numbers = #tpu.dot_dimension_numbers<[1], [0], [0], [1], [0, 0, 1, 1], [], []>} : vector<8x128xf32>, vector<128x512xf32>, vector<8x512xf32> -> vector<8x512xf32>
    %80 = arith.addf %77, %79 : vector<8x512xf32>
    %81 = vector.extract_strided_slice %80 {offsets = [0, 0], sizes = [8, 128], strides = [1, 1]} : vector<8x512xf32> to vector<8x128xf32>
    %82 = arith.negf %81 : vector<8x128xf32>
    %83 = math.exp %82 : vector<8x128xf32>
    %cst_29 = arith.constant 1.000000e+00 : f32
    %84 = vector.broadcast %cst_29 : f32 to vector<8x128xf32>
    %85 = arith.addf %84, %83 : vector<8x128xf32>
    %86 = arith.divf %84, %85 : vector<8x128xf32>
    %87 = vector.extract_strided_slice %80 {offsets = [0, 128], sizes = [8, 128], strides = [1, 1]} : vector<8x512xf32> to vector<8x128xf32>
    %88 = arith.negf %87 : vector<8x128xf32>
    %89 = math.exp %88 : vector<8x128xf32>
    %cst_30 = arith.constant 1.000000e+00 : f32
    %90 = vector.broadcast %cst_30 : f32 to vector<8x128xf32>
    %91 = arith.addf %90, %89 : vector<8x128xf32>
    %92 = arith.divf %90, %91 : vector<8x128xf32>
    %93 = vector.extract_strided_slice %80 {offsets = [0, 256], sizes = [8, 128], strides = [1, 1]} : vector<8x512xf32> to vector<8x128xf32>
    %94 = math.tanh %93 : vector<8x128xf32>
    %95 = vector.extract_strided_slice %80 {offsets = [0, 384], sizes = [8, 128], strides = [1, 1]} : vector<8x512xf32> to vector<8x128xf32>
    %96 = arith.negf %95 : vector<8x128xf32>
    %97 = math.exp %96 : vector<8x128xf32>
    %cst_31 = arith.constant 1.000000e+00 : f32
    %98 = vector.broadcast %cst_31 : f32 to vector<8x128xf32>
    %99 = arith.addf %98, %97 : vector<8x128xf32>
    %100 = arith.divf %98, %99 : vector<8x128xf32>
    %101 = arith.mulf %92, %68 : vector<8x128xf32>
    %102 = arith.mulf %86, %94 : vector<8x128xf32>
    %103 = arith.addf %101, %102 : vector<8x128xf32>
    %104 = math.tanh %103 : vector<8x128xf32>
    %105 = arith.mulf %100, %104 : vector<8x128xf32>
    %106 = arith.index_cast %c2_i32 : i32 to index
    %c0_32 = arith.constant 0 : index
    %c0_33 = arith.constant 0 : index
    %107 = vector.load %arg4[%106, %c0_32, %c0_33] : memref<8x8x128xf32, #tpu.memory_space<vmem>>, vector<1x8x128xf32>
    %108 = vector.shape_cast %107 : vector<1x8x128xf32> to vector<8x128xf32>
    %109 = vector.shape_cast %105 : vector<8x128xf32> to vector<1x8x128xf32>
    tpu.vector_store %arg4[%106, %c0_32, %c0_33], %109 {strides = array<i32>} : memref<8x8x128xf32, #tpu.memory_space<vmem>>, vector<1x8x128xf32>,
    %c3_i32 = arith.constant 3 : i32
    %110 = arith.index_cast %c3_i32 : i32 to index
    %c0_34 = arith.constant 0 : index
    %c0_35 = arith.constant 0 : index
    %111 = vector.load %arg1[%110, %c0_34, %c0_35] : memref<8x8x512xf32, #tpu.memory_space<vmem>>, vector<1x8x512xf32>
    %112 = vector.shape_cast %111 : vector<1x8x512xf32> to vector<8x512xf32>
    %c0_36 = arith.constant 0 : index
    %c0_37 = arith.constant 0 : index
    %113 = vector.load %arg3[%c0_36, %c0_37] : memref<128x512xf32, #tpu.memory_space<vmem>>, vector<128x512xf32>
    %cst_38 = arith.constant dense<0.000000e+00> : vector<8x512xf32>
    %114 = tpu.matmul %105, %113, %cst_38 {dimension_numbers = #tpu.dot_dimension_numbers<[1], [0], [0], [1], [0, 0, 1, 1], [], []>} : vector<8x128xf32>, vector<128x512xf32>, vector<8x512xf32> -> vector<8x512xf32>
    %115 = arith.addf %112, %114 : vector<8x512xf32>
    %116 = vector.extract_strided_slice %115 {offsets = [0, 0], sizes = [8, 128], strides = [1, 1]} : vector<8x512xf32> to vector<8x128xf32>
    %117 = arith.negf %116 : vector<8x128xf32>
    %118 = math.exp %117 : vector<8x128xf32>
    %cst_39 = arith.constant 1.000000e+00 : f32
    %119 = vector.broadcast %cst_39 : f32 to vector<8x128xf32>
    %120 = arith.addf %119, %118 : vector<8x128xf32>
    %121 = arith.divf %119, %120 : vector<8x128xf32>
    %122 = vector.extract_strided_slice %115 {offsets = [0, 128], sizes = [8, 128], strides = [1, 1]} : vector<8x512xf32> to vector<8x128xf32>
    %123 = arith.negf %122 : vector<8x128xf32>
    %124 = math.exp %123 : vector<8x128xf32>
    %cst_40 = arith.constant 1.000000e+00 : f32
    %125 = vector.broadcast %cst_40 : f32 to vector<8x128xf32>
    %126 = arith.addf %125, %124 : vector<8x128xf32>
    %127 = arith.divf %125, %126 : vector<8x128xf32>
    %128 = vector.extract_strided_slice %115 {offsets = [0, 256], sizes = [8, 128], strides = [1, 1]} : vector<8x512xf32> to vector<8x128xf32>
    %129 = math.tanh %128 : vector<8x128xf32>
    %130 = vector.extract_strided_slice %115 {offsets = [0, 384], sizes = [8, 128], strides = [1, 1]} : vector<8x512xf32> to vector<8x128xf32>
    %131 = arith.negf %130 : vector<8x128xf32>
    %132 = math.exp %131 : vector<8x128xf32>
    %cst_41 = arith.constant 1.000000e+00 : f32
    %133 = vector.broadcast %cst_41 : f32 to vector<8x128xf32>
    %134 = arith.addf %133, %132 : vector<8x128xf32>
    %135 = arith.divf %133, %134 : vector<8x128xf32>
    %136 = arith.mulf %127, %103 : vector<8x128xf32>
    %137 = arith.mulf %121, %129 : vector<8x128xf32>
    %138 = arith.addf %136, %137 : vector<8x128xf32>
    %139 = math.tanh %138 : vector<8x128xf32>
    %140 = arith.mulf %135, %139 : vector<8x128xf32>
    %141 = arith.index_cast %c3_i32 : i32 to index
    %c0_42 = arith.constant 0 : index
    %c0_43 = arith.constant 0 : index
    %142 = vector.load %arg4[%141, %c0_42, %c0_43] : memref<8x8x128xf32, #tpu.memory_space<vmem>>, vector<1x8x128xf32>
    %143 = vector.shape_cast %142 : vector<1x8x128xf32> to vector<8x128xf32>
    %144 = vector.shape_cast %140 : vector<8x128xf32> to vector<1x8x128xf32>
    tpu.vector_store %arg4[%141, %c0_42, %c0_43], %144 {strides = array<i32>} : memref<8x8x128xf32, #tpu.memory_space<vmem>>, vector<1x8x128xf32>,
    %c4_i32 = arith.constant 4 : i32
    %145 = arith.index_cast %c4_i32 : i32 to index
    %c0_44 = arith.constant 0 : index
    %c0_45 = arith.constant 0 : index
    %146 = vector.load %arg1[%145, %c0_44, %c0_45] : memref<8x8x512xf32, #tpu.memory_space<vmem>>, vector<1x8x512xf32>
    %147 = vector.shape_cast %146 : vector<1x8x512xf32> to vector<8x512xf32>
    %c0_46 = arith.constant 0 : index
    %c0_47 = arith.constant 0 : index
    %148 = vector.load %arg3[%c0_46, %c0_47] : memref<128x512xf32, #tpu.memory_space<vmem>>, vector<128x512xf32>
    %cst_48 = arith.constant dense<0.000000e+00> : vector<8x512xf32>
    %149 = tpu.matmul %140, %148, %cst_48 {dimension_numbers = #tpu.dot_dimension_numbers<[1], [0], [0], [1], [0, 0, 1, 1], [], []>} : vector<8x128xf32>, vector<128x512xf32>, vector<8x512xf32> -> vector<8x512xf32>
    %150 = arith.addf %147, %149 : vector<8x512xf32>
    %151 = vector.extract_strided_slice %150 {offsets = [0, 0], sizes = [8, 128], strides = [1, 1]} : vector<8x512xf32> to vector<8x128xf32>
    %152 = arith.negf %151 : vector<8x128xf32>
    %153 = math.exp %152 : vector<8x128xf32>
    %cst_49 = arith.constant 1.000000e+00 : f32
    %154 = vector.broadcast %cst_49 : f32 to vector<8x128xf32>
    %155 = arith.addf %154, %153 : vector<8x128xf32>
    %156 = arith.divf %154, %155 : vector<8x128xf32>
    %157 = vector.extract_strided_slice %150 {offsets = [0, 128], sizes = [8, 128], strides = [1, 1]} : vector<8x512xf32> to vector<8x128xf32>
    %158 = arith.negf %157 : vector<8x128xf32>
    %159 = math.exp %158 : vector<8x128xf32>
    %cst_50 = arith.constant 1.000000e+00 : f32
    %160 = vector.broadcast %cst_50 : f32 to vector<8x128xf32>
    %161 = arith.addf %160, %159 : vector<8x128xf32>
    %162 = arith.divf %160, %161 : vector<8x128xf32>
    %163 = vector.extract_strided_slice %150 {offsets = [0, 256], sizes = [8, 128], strides = [1, 1]} : vector<8x512xf32> to vector<8x128xf32>
    %164 = math.tanh %163 : vector<8x128xf32>
    %165 = vector.extract_strided_slice %150 {offsets = [0, 384], sizes = [8, 128], strides = [1, 1]} : vector<8x512xf32> to vector<8x128xf32>
    %166 = arith.negf %165 : vector<8x128xf32>
    %167 = math.exp %166 : vector<8x128xf32>
    %cst_51 = arith.constant 1.000000e+00 : f32
    %168 = vector.broadcast %cst_51 : f32 to vector<8x128xf32>
    %169 = arith.addf %168, %167 : vector<8x128xf32>
    %170 = arith.divf %168, %169 : vector<8x128xf32>
    %171 = arith.mulf %162, %138 : vector<8x128xf32>
    %172 = arith.mulf %156, %164 : vector<8x128xf32>
    %173 = arith.addf %171, %172 : vector<8x128xf32>
    %174 = math.tanh %173 : vector<8x128xf32>
    %175 = arith.mulf %170, %174 : vector<8x128xf32>
    %176 = arith.index_cast %c4_i32 : i32 to index
    %c0_52 = arith.constant 0 : index
    %c0_53 = arith.constant 0 : index
    %177 = vector.load %arg4[%176, %c0_52, %c0_53] : memref<8x8x128xf32, #tpu.memory_space<vmem>>, vector<1x8x128xf32>
    %178 = vector.shape_cast %177 : vector<1x8x128xf32> to vector<8x128xf32>
    %179 = vector.shape_cast %175 : vector<8x128xf32> to vector<1x8x128xf32>
    tpu.vector_store %arg4[%176, %c0_52, %c0_53], %179 {strides = array<i32>} : memref<8x8x128xf32, #tpu.memory_space<vmem>>, vector<1x8x128xf32>,
    %c5_i32 = arith.constant 5 : i32
    %180 = arith.index_cast %c5_i32 : i32 to index
    %c0_54 = arith.constant 0 : index
    %c0_55 = arith.constant 0 : index
    %181 = vector.load %arg1[%180, %c0_54, %c0_55] : memref<8x8x512xf32, #tpu.memory_space<vmem>>, vector<1x8x512xf32>
    %182 = vector.shape_cast %181 : vector<1x8x512xf32> to vector<8x512xf32>
    %c0_56 = arith.constant 0 : index
    %c0_57 = arith.constant 0 : index
    %183 = vector.load %arg3[%c0_56, %c0_57] : memref<128x512xf32, #tpu.memory_space<vmem>>, vector<128x512xf32>
    %cst_58 = arith.constant dense<0.000000e+00> : vector<8x512xf32>
    %184 = tpu.matmul %175, %183, %cst_58 {dimension_numbers = #tpu.dot_dimension_numbers<[1], [0], [0], [1], [0, 0, 1, 1], [], []>} : vector<8x128xf32>, vector<128x512xf32>, vector<8x512xf32> -> vector<8x512xf32>
    %185 = arith.addf %182, %184 : vector<8x512xf32>
    %186 = vector.extract_strided_slice %185 {offsets = [0, 0], sizes = [8, 128], strides = [1, 1]} : vector<8x512xf32> to vector<8x128xf32>
    %187 = arith.negf %186 : vector<8x128xf32>
    %188 = math.exp %187 : vector<8x128xf32>
    %cst_59 = arith.constant 1.000000e+00 : f32
    %189 = vector.broadcast %cst_59 : f32 to vector<8x128xf32>
    %190 = arith.addf %189, %188 : vector<8x128xf32>
    %191 = arith.divf %189, %190 : vector<8x128xf32>
    %192 = vector.extract_strided_slice %185 {offsets = [0, 128], sizes = [8, 128], strides = [1, 1]} : vector<8x512xf32> to vector<8x128xf32>
    %193 = arith.negf %192 : vector<8x128xf32>
    %194 = math.exp %193 : vector<8x128xf32>
    %cst_60 = arith.constant 1.000000e+00 : f32
    %195 = vector.broadcast %cst_60 : f32 to vector<8x128xf32>
    %196 = arith.addf %195, %194 : vector<8x128xf32>
    %197 = arith.divf %195, %196 : vector<8x128xf32>
    %198 = vector.extract_strided_slice %185 {offsets = [0, 256], sizes = [8, 128], strides = [1, 1]} : vector<8x512xf32> to vector<8x128xf32>
    %199 = math.tanh %198 : vector<8x128xf32>
    %200 = vector.extract_strided_slice %185 {offsets = [0, 384], sizes = [8, 128], strides = [1, 1]} : vector<8x512xf32> to vector<8x128xf32>
    %201 = arith.negf %200 : vector<8x128xf32>
    %202 = math.exp %201 : vector<8x128xf32>
    %cst_61 = arith.constant 1.000000e+00 : f32
    %203 = vector.broadcast %cst_61 : f32 to vector<8x128xf32>
    %204 = arith.addf %203, %202 : vector<8x128xf32>
    %205 = arith.divf %203, %204 : vector<8x128xf32>
    %206 = arith.mulf %197, %173 : vector<8x128xf32>
    %207 = arith.mulf %191, %199 : vector<8x128xf32>
    %208 = arith.addf %206, %207 : vector<8x128xf32>
    %209 = math.tanh %208 : vector<8x128xf32>
    %210 = arith.mulf %205, %209 : vector<8x128xf32>
    %211 = arith.index_cast %c5_i32 : i32 to index
    %c0_62 = arith.constant 0 : index
    %c0_63 = arith.constant 0 : index
    %212 = vector.load %arg4[%211, %c0_62, %c0_63] : memref<8x8x128xf32, #tpu.memory_space<vmem>>, vector<1x8x128xf32>
    %213 = vector.shape_cast %212 : vector<1x8x128xf32> to vector<8x128xf32>
    %214 = vector.shape_cast %210 : vector<8x128xf32> to vector<1x8x128xf32>
    tpu.vector_store %arg4[%211, %c0_62, %c0_63], %214 {strides = array<i32>} : memref<8x8x128xf32, #tpu.memory_space<vmem>>, vector<1x8x128xf32>,
    %c6_i32 = arith.constant 6 : i32
    %215 = arith.index_cast %c6_i32 : i32 to index
    %c0_64 = arith.constant 0 : index
    %c0_65 = arith.constant 0 : index
    %216 = vector.load %arg1[%215, %c0_64, %c0_65] : memref<8x8x512xf32, #tpu.memory_space<vmem>>, vector<1x8x512xf32>
    %217 = vector.shape_cast %216 : vector<1x8x512xf32> to vector<8x512xf32>
    %c0_66 = arith.constant 0 : index
    %c0_67 = arith.constant 0 : index
    %218 = vector.load %arg3[%c0_66, %c0_67] : memref<128x512xf32, #tpu.memory_space<vmem>>, vector<128x512xf32>
    %cst_68 = arith.constant dense<0.000000e+00> : vector<8x512xf32>
    %219 = tpu.matmul %210, %218, %cst_68 {dimension_numbers = #tpu.dot_dimension_numbers<[1], [0], [0], [1], [0, 0, 1, 1], [], []>} : vector<8x128xf32>, vector<128x512xf32>, vector<8x512xf32> -> vector<8x512xf32>
    %220 = arith.addf %217, %219 : vector<8x512xf32>
    %221 = vector.extract_strided_slice %220 {offsets = [0, 0], sizes = [8, 128], strides = [1, 1]} : vector<8x512xf32> to vector<8x128xf32>
    %222 = arith.negf %221 : vector<8x128xf32>
    %223 = math.exp %222 : vector<8x128xf32>
    %cst_69 = arith.constant 1.000000e+00 : f32
    %224 = vector.broadcast %cst_69 : f32 to vector<8x128xf32>
    %225 = arith.addf %224, %223 : vector<8x128xf32>
    %226 = arith.divf %224, %225 : vector<8x128xf32>
    %227 = vector.extract_strided_slice %220 {offsets = [0, 128], sizes = [8, 128], strides = [1, 1]} : vector<8x512xf32> to vector<8x128xf32>
    %228 = arith.negf %227 : vector<8x128xf32>
    %229 = math.exp %228 : vector<8x128xf32>
    %cst_70 = arith.constant 1.000000e+00 : f32
    %230 = vector.broadcast %cst_70 : f32 to vector<8x128xf32>
    %231 = arith.addf %230, %229 : vector<8x128xf32>
    %232 = arith.divf %230, %231 : vector<8x128xf32>
    %233 = vector.extract_strided_slice %220 {offsets = [0, 256], sizes = [8, 128], strides = [1, 1]} : vector<8x512xf32> to vector<8x128xf32>
    %234 = math.tanh %233 : vector<8x128xf32>
    %235 = vector.extract_strided_slice %220 {offsets = [0, 384], sizes = [8, 128], strides = [1, 1]} : vector<8x512xf32> to vector<8x128xf32>
    %236 = arith.negf %235 : vector<8x128xf32>
    %237 = math.exp %236 : vector<8x128xf32>
    %cst_71 = arith.constant 1.000000e+00 : f32
    %238 = vector.broadcast %cst_71 : f32 to vector<8x128xf32>
    %239 = arith.addf %238, %237 : vector<8x128xf32>
    %240 = arith.divf %238, %239 : vector<8x128xf32>
    %241 = arith.mulf %232, %208 : vector<8x128xf32>
    %242 = arith.mulf %226, %234 : vector<8x128xf32>
    %243 = arith.addf %241, %242 : vector<8x128xf32>
    %244 = math.tanh %243 : vector<8x128xf32>
    %245 = arith.mulf %240, %244 : vector<8x128xf32>
    %246 = arith.index_cast %c6_i32 : i32 to index
    %c0_72 = arith.constant 0 : index
    %c0_73 = arith.constant 0 : index
    %247 = vector.load %arg4[%246, %c0_72, %c0_73] : memref<8x8x128xf32, #tpu.memory_space<vmem>>, vector<1x8x128xf32>
    %248 = vector.shape_cast %247 : vector<1x8x128xf32> to vector<8x128xf32>
    %249 = vector.shape_cast %245 : vector<8x128xf32> to vector<1x8x128xf32>
    tpu.vector_store %arg4[%246, %c0_72, %c0_73], %249 {strides = array<i32>} : memref<8x8x128xf32, #tpu.memory_space<vmem>>, vector<1x8x128xf32>,
    %c7_i32 = arith.constant 7 : i32
    %250 = arith.index_cast %c7_i32 : i32 to index
    %c0_74 = arith.constant 0 : index
    %c0_75 = arith.constant 0 : index
    %251 = vector.load %arg1[%250, %c0_74, %c0_75] : memref<8x8x512xf32, #tpu.memory_space<vmem>>, vector<1x8x512xf32>
    %252 = vector.shape_cast %251 : vector<1x8x512xf32> to vector<8x512xf32>
    %c0_76 = arith.constant 0 : index
    %c0_77 = arith.constant 0 : index
    %253 = vector.load %arg3[%c0_76, %c0_77] : memref<128x512xf32, #tpu.memory_space<vmem>>, vector<128x512xf32>
    %cst_78 = arith.constant dense<0.000000e+00> : vector<8x512xf32>
    %254 = tpu.matmul %245, %253, %cst_78 {dimension_numbers = #tpu.dot_dimension_numbers<[1], [0], [0], [1], [0, 0, 1, 1], [], []>} : vector<8x128xf32>, vector<128x512xf32>, vector<8x512xf32> -> vector<8x512xf32>
    %255 = arith.addf %252, %254 : vector<8x512xf32>
    %256 = vector.extract_strided_slice %255 {offsets = [0, 0], sizes = [8, 128], strides = [1, 1]} : vector<8x512xf32> to vector<8x128xf32>
    %257 = arith.negf %256 : vector<8x128xf32>
    %258 = math.exp %257 : vector<8x128xf32>
    %cst_79 = arith.constant 1.000000e+00 : f32
    %259 = vector.broadcast %cst_79 : f32 to vector<8x128xf32>
    %260 = arith.addf %259, %258 : vector<8x128xf32>
    %261 = arith.divf %259, %260 : vector<8x128xf32>
    %262 = vector.extract_strided_slice %255 {offsets = [0, 128], sizes = [8, 128], strides = [1, 1]} : vector<8x512xf32> to vector<8x128xf32>
    %263 = arith.negf %262 : vector<8x128xf32>
    %264 = math.exp %263 : vector<8x128xf32>
    %cst_80 = arith.constant 1.000000e+00 : f32
    %265 = vector.broadcast %cst_80 : f32 to vector<8x128xf32>
    %266 = arith.addf %265, %264 : vector<8x128xf32>
    %267 = arith.divf %265, %266 : vector<8x128xf32>
    %268 = vector.extract_strided_slice %255 {offsets = [0, 256], sizes = [8, 128], strides = [1, 1]} : vector<8x512xf32> to vector<8x128xf32>
    %269 = math.tanh %268 : vector<8x128xf32>
    %270 = vector.extract_strided_slice %255 {offsets = [0, 384], sizes = [8, 128], strides = [1, 1]} : vector<8x512xf32> to vector<8x128xf32>
    %271 = arith.negf %270 : vector<8x128xf32>
    %272 = math.exp %271 : vector<8x128xf32>
    %cst_81 = arith.constant 1.000000e+00 : f32
    %273 = vector.broadcast %cst_81 : f32 to vector<8x128xf32>
    %274 = arith.addf %273, %272 : vector<8x128xf32>
    %275 = arith.divf %273, %274 : vector<8x128xf32>
    %276 = arith.mulf %267, %243 : vector<8x128xf32>
    %277 = arith.mulf %261, %269 : vector<8x128xf32>
    %278 = arith.addf %276, %277 : vector<8x128xf32>
    %279 = math.tanh %278 : vector<8x128xf32>
    %280 = arith.mulf %275, %279 : vector<8x128xf32>
    %281 = arith.index_cast %c7_i32 : i32 to index
    %c0_82 = arith.constant 0 : index
    %c0_83 = arith.constant 0 : index
    %282 = vector.load %arg4[%281, %c0_82, %c0_83] : memref<8x8x128xf32, #tpu.memory_space<vmem>>, vector<1x8x128xf32>
    %283 = vector.shape_cast %282 : vector<1x8x128xf32> to vector<8x128xf32>
    %284 = vector.shape_cast %280 : vector<8x128xf32> to vector<1x8x128xf32>
    tpu.vector_store %arg4[%281, %c0_82, %c0_83], %284 {strides = array<i32>} : memref<8x8x128xf32, #tpu.memory_space<vmem>>, vector<1x8x128xf32>,
    %c8_i32 = arith.constant 8 : i32
    %c0_84 = arith.constant 0 : index
    %c0_85 = arith.constant 0 : index
    %285 = vector.load %arg6[%c0_84, %c0_85] : memref<8x128xf32, #tpu.memory_space<vmem>>, vector<8x128xf32>
    tpu.vector_store %arg6[%c0_84, %c0_85], %280 {strides = array<i32>} : memref<8x128xf32, #tpu.memory_space<vmem>>, vector<8x128xf32>,
    %c0_86 = arith.constant 0 : index
    %c0_87 = arith.constant 0 : index
    %286 = vector.load %arg7[%c0_86, %c0_87] : memref<8x128xf32, #tpu.memory_space<vmem>>, vector<8x128xf32>
    tpu.vector_store %arg7[%c0_86, %c0_87], %278 {strides = array<i32>} : memref<8x128xf32, #tpu.memory_space<vmem>>, vector<8x128xf32>,
    %c0_i32_88 = arith.constant 0 : i32
    %287 = arith.cmpi eq, %arg0, %c0_i32_88 : i32
    %288 = arith.extui %287 : i1 to i32
    %c0_i32_89 = arith.constant 0 : i32
    %289 = arith.cmpi ne, %288, %c0_i32_89 : i32
    scf.if %289 {
      %cst_90 = arith.constant -2.000000e+01 : f32
      %cst_91 = arith.constant 2.000000e+01 : f32
      %290 = vector.broadcast %cst_90 : f32 to vector<8x128xf32>
      %291 = arith.maximumf %290, %280 : vector<8x128xf32>
      %292 = vector.broadcast %cst_91 : f32 to vector<8x128xf32>
      %293 = arith.minimumf %292, %291 : vector<8x128xf32>
      %c0_92 = arith.constant 0 : index
      %c0_93 = arith.constant 0 : index
      %294 = vector.load %arg5[%c0_92, %c0_93] : memref<8x256xf32, #tpu.memory_space<vmem>>, vector<8x128xf32>
      tpu.vector_store %arg5[%c0_92, %c0_93], %293 {strides = array<i32>} : memref<8x256xf32, #tpu.memory_space<vmem>>, vector<8x128xf32>,
      %c0_94 = arith.constant 0 : index
      %c128 = arith.constant 128 : index
      %295 = vector.load %arg5[%c0_94, %c128] : memref<8x256xf32, #tpu.memory_space<vmem>>, vector<8x128xf32>
      tpu.vector_store %arg5[%c0_94, %c128], %278 {strides = array<i32>} : memref<8x256xf32, #tpu.memory_space<vmem>>, vector<8x128xf32>,
    } else {
    }
    return
  }
  func.func @transform_0(%arg0: i32) -> (i32, i32, i32) {
    %c0_i32 = arith.constant 0 : i32
    %c0_i32_0 = arith.constant 0 : i32
    %c0_i32_1 = arith.constant 0 : i32
    return %arg0, %c0_i32, %c0_i32_0 : i32, i32, i32
  }
  func.func @transform_1(%arg0: i32) -> (i32, i32) {
    %c0_i32 = arith.constant 0 : i32
    %c0_i32_0 = arith.constant 0 : i32
    %c0_i32_1 = arith.constant 0 : i32
    return %c0_i32, %c0_i32_0 : i32, i32
  }
  func.func @transform_2(%arg0: i32) -> (i32, i32) {
    %c0_i32 = arith.constant 0 : i32
    %c0_i32_0 = arith.constant 0 : i32
    %c0_i32_1 = arith.constant 0 : i32
    return %c0_i32, %c0_i32_0 : i32, i32
  }
  func.func @transform_3(%arg0: i32) -> (i32, i32, i32) {
    %c0_i32 = arith.constant 0 : i32
    %c0_i32_0 = arith.constant 0 : i32
    %c0_i32_1 = arith.constant 0 : i32
    return %arg0, %c0_i32, %c0_i32_0 : i32, i32, i32
  }
  func.func @transform_4(%arg0: i32) -> (i32, i32) {
    %c0_i32 = arith.constant 0 : i32
    %c0_i32_0 = arith.constant 0 : i32
    %c0_i32_1 = arith.constant 0 : i32
    return %c0_i32, %c0_i32_0 : i32, i32
  }
}

</mosaic_0001>

<bundles_post_ra>
// kernel: ntm_forward_seq.1
= control target key start
LH: loop header
LB: loop body
LE: loop exit
PB: predicated region body
PF: predicated region fallthrough
CT: control target
= control target key end

     0   :  { %v3555_v3 = vmov 0.0   ;;  %s3550_s2 = inlined_call_operand.vmem [shape: f32[128,512], index: 2, kind: input, shape index: {}]   ;;  %s3551_s1 = inlined_call_operand.vmem [shape: f32[8,256], index: 1, kind: input, shape index: {}, may-alias: {1,4}]   ;;  %s3552_s0 = inlined_call_operand.vmem [shape: f32[8,8,512], index: 0, kind: input, shape index: {}]   ;;  %s3553_s3 = inlined_call_operand.vmem [shape: f32[8,8,128], index: 3, kind: output, shape index: {0}]   ;;  %s3554_s4 = inlined_call_operand.vmem [shape: f32[8,256], index: 4, kind: output, shape index: {1}, may-alias: {1,4}]  }
   0x1   :  { %v2187_v0 = vld [vmem:[%s3550_s2 + $0x1e8] sm:$0xff]  ;;  %v2192_v1 = vld [vmem:[%s3550_s2 + $0x1e0] sm:$0xff]  ;;  %158 = vmatprep.mubr.f32.mxu0 %v3555_v3  ;;  %229 = vmatprep.mubr.f32.mxu1 %v3555_v3  ;;  %v2234_v9 = vld [vmem:[%s3550_s2 + $0x1f8] sm:$0xff] }
   0x2   :  { %3622 = vst [vmem:[#allocation4_spill] sm:$0xff] %v2187_v0  ;;  %v2197_v2 = vld [vmem:[%s3550_s2 + $0x1c8] sm:$0xff]  ;;  %94 = vmatprep.subr.mxu0 %v2187_v0  ;;  %v2205_v4 = vld [vmem:[%s3550_s2 + $0x1c0] sm:$0xff]  ;;  %3623 = vst [vmem:[#allocation5_spill] sm:$0xff] %v2234_v9  ;;  %165 = vmatprep.subr.mxu1 %v2234_v9 }
   0x3   :  { %95 = vmatpush1.msra.mxu0 %v2192_v1  ;;  %v2211_v5 = vld [vmem:[%s3550_s2 + $0x1a8] sm:$0xff]  ;;  %v2217_v6 = vld [vmem:[%s3550_s2 + $0x1a0] sm:$0xff]  ;;  %v2246_v11 = vld [vmem:[%s3550_s2 + $0x1f0] sm:$0xff] }
   0x4   :  { %96 = vmatprep.subr.mxu0 %v2197_v2  ;;  %v2223_v7 = vld [vmem:[%s3550_s2 + $0x188] sm:$0xff]  ;;  %v2229_v8 = vld [vmem:[%s3550_s2 + $0x180] sm:$0xff]  ;;  %166 = vmatpush1.msra.mxu1 %v2246_v11  ;;  %v2258_v13 = vld [vmem:[%s3550_s2 + $0x1d8] sm:$0xff] }
   0x5   :  { %97 = vmatpush1.msra.mxu0 %v2205_v4  ;;  %v2240_v10 = vld [vmem:[%s3550_s2 + $0x168] sm:$0xff]  ;;  %v2252_v12 = vld [vmem:[%s3550_s2 + $0x160] sm:$0xff]  ;;  %v2263_v14 = vld [vmem:[%s3550_s2 + $0x1d0] sm:$0xff]  ;;  %167 = vmatprep.subr.mxu1 %v2258_v13 }
   0x6   :  { %98 = vmatprep.subr.mxu0 %v2211_v5  ;;  %v2269_v15 = vld [vmem:[%s3550_s2 + $0x148] sm:$0xff]  ;;  %v2275_v16 = vld [vmem:[%s3550_s2 + $0x1b8] sm:$0xff]  ;;  %v2281_v17 = vld [vmem:[%s3550_s2 + $0x140] sm:$0xff]  ;;  %168 = vmatpush1.msra.mxu1 %v2263_v14 }
   0x7   :  { %99 = vmatpush1.msra.mxu0 %v2217_v6  ;;  %v2287_v18 = vld [vmem:[%s3550_s2 + $0x1b0] sm:$0xff]  ;;  %v2292_v19 = vld [vmem:[%s3550_s2 + $0x198] sm:$0xff]  ;;  %v2298_v20 = vld [vmem:[%s3550_s2 + $0x128] sm:$0xff]  ;;  %169 = vmatprep.subr.mxu1 %v2275_v16 }
   0x8   :  { %100 = vmatprep.subr.mxu0 %v2223_v7  ;;  %v2304_v21 = vld [vmem:[%s3550_s2 + $0x190] sm:$0xff]  ;;  %v2310_v22 = vld [vmem:[%s3550_s2 + $0x120] sm:$0xff]  ;;  %170 = vmatpush1.msra.mxu1 %v2287_v18  ;;  %v2316_v23 = vld [vmem:[%s3550_s2 + $0x178] sm:$0xff] }
   0x9   :  { %101 = vmatpush1.msra.mxu0 %v2229_v8  ;;  %v2322_v24 = vld [vmem:[%s3550_s2 + $0x108] sm:$0xff]  ;;  %171 = vmatprep.subr.mxu1 %v2292_v19  ;;  %v2328_v25 = vld [vmem:[%s3550_s2 + $0x170] sm:$0xff]  ;;  %v2334_v26 = vld [vmem:[%s3550_s2 + $0x100] sm:$0xff] }
   0xa   :  { %102 = vmatprep.subr.mxu0 %v2240_v10  ;;  %172 = vmatpush1.msra.mxu1 %v2304_v21  ;;  %v2340_v27 = vld [vmem:[%s3550_s2 + $0x158] sm:$0xff]  ;;  %v2346_v28 = vld [vmem:[%s3550_s2 + $0xe8] sm:$0xff]  ;;  %v2352_v29 = vld [vmem:[%s3550_s2 + $0x150] sm:$0xff] }
   0xb   :  { %103 = vmatpush1.msra.mxu0 %v2252_v12  ;;  %173 = vmatprep.subr.mxu1 %v2316_v23  ;;  %v2358_v30 = vld [vmem:[%s3550_s2 + $0xe0] sm:$0xff]  ;;  %v2364_v31 = vld [vmem:[%s3550_s2 + $0x138] sm:$0xff]  ;;  %v2370_v32 = vld [vmem:[%s3550_s2 + $0xc8] sm:$0xff] }
   0xc   :  { %104 = vmatprep.subr.mxu0 %v2269_v15  ;;  %174 = vmatpush1.msra.mxu1 %v2328_v25  ;;  %v2376_v33 = vld [vmem:[%s3550_s2 + $0x130] sm:$0xff]  ;;  %v2382_v34 = vld [vmem:[%s3550_s2 + $0xc0] sm:$0xff]  ;;  %v2388_v35 = vld [vmem:[%s3550_s2 + $0x118] sm:$0xff] }
   0xd   :  { %105 = vmatpush1.msra.mxu0 %v2281_v17  ;;  %175 = vmatprep.subr.mxu1 %v2340_v27  ;;  %v2394_v36 = vld [vmem:[%s3550_s2 + $0xa8] sm:$0xff]  ;;  %v2400_v37 = vld [vmem:[%s3550_s2 + $0x110] sm:$0xff]  ;;  %v2406_v38 = vld [vmem:[%s3550_s2 + $0xa0] sm:$0xff] }
   0xe   :  { %106 = vmatprep.subr.mxu0 %v2298_v20  ;;  %176 = vmatpush1.msra.mxu1 %v2352_v29  ;;  %v2412_v39 = vld [vmem:[%s3550_s2 + $0xf8] sm:$0xff]  ;;  %v2418_v40 = vld [vmem:[%s3550_s2 + $0x88] sm:$0xff]  ;;  %v2424_v41 = vld [vmem:[%s3550_s2 + $0xf0] sm:$0xff] }
   0xf   :  { %107 = vmatpush1.msra.mxu0 %v2310_v22  ;;  %177 = vmatprep.subr.mxu1 %v2364_v31  ;;  %v2430_v42 = vld [vmem:[%s3550_s2 + $0x80] sm:$0xff]  ;;  %v2436_v43 = vld [vmem:[%s3550_s2 + $0xd8] sm:$0xff]  ;;  %v2442_v44 = vld [vmem:[%s3550_s2 + $0x68] sm:$0xff] }
  0x10   :  { %108 = vmatprep.subr.mxu0 %v2322_v24  ;;  %178 = vmatpush1.msra.mxu1 %v2376_v33  ;;  %v2448_v45 = vld [vmem:[%s3550_s2 + $0xd0] sm:$0xff]  ;;  %v2454_v46 = vld [vmem:[%s3550_s2 + $0x60] sm:$0xff]  ;;  %v2460_v47 = vld [vmem:[%s3550_s2 + $0xb8] sm:$0xff] }
  0x11   :  { %109 = vmatpush1.msra.mxu0 %v2334_v26  ;;  %179 = vmatprep.subr.mxu1 %v2388_v35  ;;  %3624 = vst [vmem:[#allocation6_spill] sm:$0xff] %v2454_v46  ;;  %v2466_v48 = vld [vmem:[%s3550_s2 + $0x48] sm:$0xff]  ;;  %v2472_v49 = vld [vmem:[%s3550_s2 + $0xb0] sm:$0xff]  ;;  %v2478_v50 = vld [vmem:[%s3550_s2 + $0x40] sm:$0xff] }
  0x12   :  { %110 = vmatprep.subr.mxu0 %v2346_v28  ;;  %180 = vmatpush1.msra.mxu1 %v2400_v37  ;;  %3625 = vst [vmem:[#allocation7_spill] sm:$0xff] %v2466_v48  ;;  %3626 = vst [vmem:[#allocation8_spill] sm:$0xff] %v2478_v50  ;;  %v2484_v51 = vld [vmem:[%s3550_s2 + $0x98] sm:$0xff]  ;;  %v2490_v52 = vld [vmem:[%s3550_s2 + $0x28] sm:$0xff] }
  0x13   :  { %111 = vmatpush1.msra.mxu0 %v2358_v30  ;;  %181 = vmatprep.subr.mxu1 %v2412_v39  ;;  %3627 = vst [vmem:[#allocation9_spill] sm:$0xff] %v2490_v52  ;;  %v2496_v53 = vld [vmem:[%s3550_s2 + $0x90] sm:$0xff]  ;;  %v2502_v54 = vld [vmem:[%s3550_s2 + $0x20] sm:$0xff]  ;;  %v2508_v55 = vld [vmem:[%s3550_s2 + $0x78] sm:$0xff] }
  0x14   :  { %112 = vmatprep.subr.mxu0 %v2370_v32  ;;  %182 = vmatpush1.msra.mxu1 %v2424_v41  ;;  %3628 = vst [vmem:[#allocation10_spill] sm:$0xff] %v2502_v54  ;;  %3629 = vst [vmem:[#allocation11_spill] sm:$0xff] %v2508_v55  ;;  %v2514_v56 = vld [vmem:[%s3550_s2 + $0x8] sm:$0xff]  ;;  %v2520_v57 = vld [vmem:[%s3550_s2 + $0x70] sm:$0xff] }
  0x15   :  { %113 = vmatpush1.msra.mxu0 %v2382_v34  ;;  %183 = vmatprep.subr.mxu1 %v2436_v43  ;;  %3630 = vst [vmem:[#allocation12_spill] sm:$0xff] %v2514_v56  ;;  %3631 = vst [vmem:[#allocation13_spill] sm:$0xff] %v2520_v57  ;;  %v2526_v58 = vld [vmem:[%s3550_s2] sm:$0xff]  ;;  %v2532_v59 = vld [vmem:[%s3550_s2 + $0x58] sm:$0xff] }
  0x16   :  { %114 = vmatprep.subr.mxu0 %v2394_v36  ;;  %184 = vmatpush1.msra.mxu1 %v2448_v45  ;;  %3632 = vst [vmem:[#allocation14_spill] sm:$0xff] %v2526_v58  ;;  %3633 = vst [vmem:[#allocation15_spill] sm:$0xff] %v2532_v59  ;;  %v20_v60 = vld [vmem:[%s3551_s1] sm:$0xff]  ;;  %v2542_v61 = vld [vmem:[%s3550_s2 + $0x50] sm:$0xff] }
  0x17   :  { %115 = vmatpush1.msra.mxu0 %v2406_v38  ;;  %185 = vmatprep.subr.mxu1 %v2460_v47  ;;  %3634 = vst [vmem:[#allocation16_spill] sm:$0xff] %v2542_v61  ;;  %v2549_v62 = vld [vmem:[%s3550_s2 + $0x38] sm:$0xff]  ;;  %v2556_v63 = vld [vmem:[%s3550_s2 + $0x30] sm:$0xff] }
  0x18   :  { %116 = vmatprep.subr.mxu0 %v2418_v40  ;;  %186 = vmatpush1.msra.mxu1 %v2472_v49  ;;  %3635 = vst [vmem:[#allocation17_spill] sm:$0xff] %v2549_v62  ;;  %3636 = vst [vmem:[#allocation18_spill] sm:$0xff] %v2556_v63  ;;  %v2562_v3 = vld [vmem:[%s3550_s2 + $0x18] sm:$0xff] }
  0x19   :  { %117 = vmatpush1.msra.mxu0 %v2430_v42  ;;  %187 = vmatprep.subr.mxu1 %v2484_v51  ;;  %3637 = vst [vmem:[#allocation19_spill] sm:$0xff] %v2562_v3 }
  0x1a   :  { %118 = vmatprep.subr.mxu0 %v2442_v44  ;;  %188 = vmatpush1.msra.mxu1 %v2496_v53 }
  0x1b   :  { %119 = vmatpush1.msra.mxu0 %v2454_v46  ;;  %189 = vmatprep.subr.mxu1 %v2508_v55 }
  0x1c   :  { %120 = vmatprep.subr.mxu0 %v2466_v48  ;;  %190 = vmatpush1.msra.mxu1 %v2520_v57 }
  0x1d   :  { %121 = vmatpush1.msra.mxu0 %v2478_v50  ;;  %191 = vmatprep.subr.mxu1 %v2532_v59 }
  0x1e   :  { %122 = vmatprep.subr.mxu0 %v2490_v52  ;;  %192 = vmatpush1.msra.mxu1 %v2542_v61 }
  0x1f   :  { %123 = vmatpush1.msra.mxu0 %v2502_v54  ;;  %193 = vmatprep.subr.mxu1 %v2549_v62 }
  0x20   :  { %124 = vmatprep.subr.mxu0 %v2514_v56  ;;  %194 = vmatpush1.msra.mxu1 %v2556_v63 }
  0x21   :  { %125 = vmatpush1.msra.mxu0 %v2526_v58  ;;  %v2568_v58 = vld [vmem:[%s3550_s2 + $0x10] sm:$0xff]  ;;  %195 = vmatprep.subr.mxu1 %v2562_v3 }
  0x22   :  { %159 = vmatmul.mubr.f32.vlgmr.msra.gmra.mxu0 %v20_v60  ;;  %3638 = vst [vmem:[#allocation20_spill] sm:$0xff] %v2568_v58  ;;  %334 = vmatprep.subr.mxu0 %v2187_v0 }
  0x23   :  { %335 = vmatpush1.msra.mxu0 %v2192_v1  ;;  %196 = vmatpush1.msra.mxu1 %v2568_v58 }
  0x24   :  { %336 = vmatprep.subr.mxu0 %v2197_v2  ;;  %230 = vmatmul.mubr.f32.vlgmr.msra.gmra.mxu1 %v20_v60  ;;  %v3639_v60 = vld [vmem:[#allocation14_spill] sm:$0xff] }
  0x25   :  { %337 = vmatpush1.msra.mxu0 %v2205_v4  ;;  %405 = vmatprep.subr.mxu1 %v2234_v9 }
  0x26   :  { %406 = vmatpush1.msra.mxu1 %v2246_v11  ;;  %338 = vmatprep.subr.mxu0 %v2211_v5 }
  0x27   :  { %407 = vmatprep.subr.mxu1 %v2258_v13  ;;  %339 = vmatpush1.msra.mxu0 %v2217_v6 }
  0x28   :  { %408 = vmatpush1.msra.mxu1 %v2263_v14  ;;  %340 = vmatprep.subr.mxu0 %v2223_v7 }
  0x29   :  { %409 = vmatprep.subr.mxu1 %v2275_v16  ;;  %341 = vmatpush1.msra.mxu0 %v2229_v8 }
  0x2a   :  { %410 = vmatpush1.msra.mxu1 %v2287_v18  ;;  %342 = vmatprep.subr.mxu0 %v2240_v10 }
  0x2b   :  { %411 = vmatprep.subr.mxu1 %v2292_v19  ;;  %343 = vmatpush1.msra.mxu0 %v2252_v12 }
  0x2c   :  { %412 = vmatpush1.msra.mxu1 %v2304_v21  ;;  %344 = vmatprep.subr.mxu0 %v2269_v15 }
  0x2d   :  { %413 = vmatprep.subr.mxu1 %v2316_v23  ;;  %345 = vmatpush1.msra.mxu0 %v2281_v17 }
  0x2e   :  { %414 = vmatpush1.msra.mxu1 %v2328_v25  ;;  %346 = vmatprep.subr.mxu0 %v2298_v20 }
  0x2f   :  { %415 = vmatprep.subr.mxu1 %v2340_v27  ;;  %347 = vmatpush1.msra.mxu0 %v2310_v22 }
  0x30   :  { %416 = vmatpush1.msra.mxu1 %v2352_v29  ;;  %348 = vmatprep.subr.mxu0 %v2322_v24 }
  0x31   :  { %417 = vmatprep.subr.mxu1 %v2364_v31  ;;  %349 = vmatpush1.msra.mxu0 %v2334_v26 }
  0x32   :  { %418 = vmatpush1.msra.mxu1 %v2376_v33  ;;  %350 = vmatprep.subr.mxu0 %v2346_v28 }
  0x33   :  { %419 = vmatprep.subr.mxu1 %v2388_v35  ;;  %351 = vmatpush1.msra.mxu0 %v2358_v30 }
  0x34   :  { %420 = vmatpush1.msra.mxu1 %v2400_v37  ;;  %352 = vmatprep.subr.mxu0 %v2370_v32 }
  0x35   :  { %421 = vmatprep.subr.mxu1 %v2412_v39  ;;  %353 = vmatpush1.msra.mxu0 %v2382_v34 }
  0x36   :  { %422 = vmatpush1.msra.mxu1 %v2424_v41  ;;  %354 = vmatprep.subr.mxu0 %v2394_v36 }
  0x37   :  { %423 = vmatprep.subr.mxu1 %v2436_v43  ;;  %355 = vmatpush1.msra.mxu0 %v2406_v38 }
  0x38   :  { %424 = vmatpush1.msra.mxu1 %v2448_v45  ;;  %356 = vmatprep.subr.mxu0 %v2418_v40 }
  0x39   :  { %425 = vmatprep.subr.mxu1 %v2460_v47  ;;  %357 = vmatpush1.msra.mxu0 %v2430_v42 }
  0x3a   :  { %426 = vmatpush1.msra.mxu1 %v2472_v49  ;;  %358 = vmatprep.subr.mxu0 %v2442_v44 }
  0x3b   :  { %427 = vmatprep.subr.mxu1 %v2484_v51  ;;  %359 = vmatpush1.msra.mxu0 %v2454_v46 }
  0x3c   :  { %428 = vmatpush1.msra.mxu1 %v2496_v53  ;;  %360 = vmatprep.subr.mxu0 %v2466_v48  ;;  %v3640_v48 = vmov 0.0  }
  0x3d   :  { %429 = vmatprep.subr.mxu1 %v2508_v55  ;;  %361 = vmatpush1.msra.mxu0 %v2478_v50 }
  0x3e   :  { %430 = vmatpush1.msra.mxu1 %v2520_v57  ;;  %362 = vmatprep.subr.mxu0 %v2490_v52 }
  0x3f   :  { %431 = vmatprep.subr.mxu1 %v2532_v59  ;;  %363 = vmatpush1.msra.mxu0 %v2502_v54 }
  0x40   :  { %432 = vmatpush1.msra.mxu1 %v2542_v61  ;;  %364 = vmatprep.subr.mxu0 %v2514_v56  ;;  %v26_v56 = vld [vmem:[%s3552_s0] sm:$0xff]  ;;  %v28_v61 = vld [vmem:[%s3552_s0 + $0x10] sm:$0xff] }
  0x41   :  { %433 = vmatprep.subr.mxu1 %v2549_v62  ;;  %365 = vmatpush1.msra.mxu0 %v3639_v60  ;;  %v27_v60 = vld [vmem:[%s3552_s0 + $0x8] sm:$0xff] }
  0x42   :  { %434 = vmatpush1.msra.mxu1 %v2556_v63  ;;  %398 = vmatprep.mubr.f32.mxu0 %v3640_v48 }
  0x43   :  { %435 = vmatprep.subr.mxu1 %v2562_v3  ;;  %469 = vmatprep.mubr.f32.mxu1 %v3640_v48 }
  0x44   :  { %436 = vmatpush1.msra.mxu1 %v2568_v58  ;;  %575 = vmatprep.subr.mxu0 %v2187_v0 }
  0x45   :  { %646 = vmatprep.subr.mxu1 %v2234_v9  ;;  %v29_v9 = vld [vmem:[%s3552_s0 + $0x18] sm:$0xff] }
  0xe2   :  { %v160_v54 = vpop.f32.mrf.mxu0 }
  0xe3   :  { %v236_v63 = vadd.f32 %v160_v54, %v26_v56 }
  0xe4   :  { %v162_v62 = vpop.f32.mrf.mxu0  ;;  %v231_v58 = vpop.f32.mrf.mxu1 }
  0xe5   :  { %v1969_v3 = vmul.f32 -1.442695, %v236_v63  ;;  %v237_v52 = vadd.f32 %v162_v62, %v27_v60  ;;  %v238_v59 = vadd.f32 %v231_v58, %v28_v61  ;;  %v22_v60 = vld [vmem:[%s3551_s1 + $0x8] sm:$0xff]  ;;  %v3657_v61 = vld [vmem:[#allocation4_spill] sm:$0xff] }
  0xe6   :  { %v233_v0 = vpop.f32.mrf.mxu1 }
  0xe7   :  { %2030 = vpow2.f32 %v1969_v3  ;;  %v1970_v48 = vmul.f32 -1.442695, %v237_v52  ;;  %v239_v50 = vadd.f32 %v233_v0, %v29_v9 }
  0xe9   :  { %2032 = vpow2.f32 %v1970_v48  ;;  %v1971_v57 = vmul.f32 -1.442695, %v239_v50 }
  0xea   :  { %2034 = vtanh.f32 %v238_v59 }
  0xeb   :  { %2036 = vpow2.f32 %v1971_v57 }
  0xf4   :  { %v2031_v54 = vpop.eup %2030 }
  0xf5   :  { %v243_v56 = vadd.f32 1.0, %v2031_v54  ;;  %v3658_v54 = vld [vmem:[#allocation5_spill] sm:$0xff] }
  0xf6   :  { %v2033_v62 = vpop.eup %2032 }
  0xf7   :  { %2038 = vrcp.f32 %v243_v56  ;;  %v249_v3 = vadd.f32 1.0, %v2033_v62  ;;  %v2035_v48 = vpop.eup %2034  ;;  %v1972_v56 = vld [vmem:[%s3552_s0 + $0x20] sm:$0xff] }
  0xf8   :  { %v2037_v52 = vpop.eup %2036 }
  0xf9   :  { %2040 = vrcp.f32 %v249_v3  ;;  %v256_v55 = vadd.f32 1.0, %v2037_v52  ;;  %v1973_v3 = vld [vmem:[%s3552_s0 + $0x28] sm:$0xff] }
  0xfb   :  { %2042 = vrcp.f32 %v256_v55  ;;  %v3656_v55 = vld [vmem:[#allocation20_spill] sm:$0xff] }
 0x104   :  { %v2039_v63 = vpop.eup %2038 }
 0x105   :  { %v260_v9 = vmul.f32 %v2039_v63, %v2035_v48 }
 0x106   :  { %v2041_v46 = vpop.eup %2040 }
 0x107   :  { %v259_v0 = vmul.f32 %v2041_v46, %v22_v60  ;;  %v3655_v46 = vmov 0.0  }
 0x108   :  { %v2043_v57 = vpop.eup %2042 }
 0x109   :  { %v2656_v50 = vadd.f32 %v260_v9, %v259_v0 }
 0x10b   :  { %2044 = vtanh.f32 %v2656_v50 }
 0x118   :  { %v2045_v58 = vpop.eup %2044 }
 0x119   :  { %v263_v59 = vmul.f32 %v2045_v58, %v2043_v57  ;;  %v1975_v57 = vld [vmem:[%s3552_s0 + $0x38] sm:$0xff] }
 0x11b   :  { %264 = vst [vmem:[%s3553_s3] sm:$0xff] %v263_v59  ;;  %399 = vmatmul.mubr.f32.vlgmr.msra.gmra.mxu0 %v263_v59  ;;  %470 = vmatmul.mubr.f32.vlgmr.msra.gmra.mxu1 %v263_v59 }
 0x11c   :  { %576 = vmatpush1.msra.mxu0 %v2192_v1  ;;  %647 = vmatpush1.msra.mxu1 %v2246_v11 }
 0x11d   :  { %577 = vmatprep.subr.mxu0 %v2197_v2  ;;  %648 = vmatprep.subr.mxu1 %v2258_v13 }
 0x11e   :  { %578 = vmatpush1.msra.mxu0 %v2205_v4  ;;  %649 = vmatpush1.msra.mxu1 %v2263_v14 }
 0x11f   :  { %579 = vmatprep.subr.mxu0 %v2211_v5  ;;  %650 = vmatprep.subr.mxu1 %v2275_v16 }
 0x120   :  { %580 = vmatpush1.msra.mxu0 %v2217_v6  ;;  %651 = vmatpush1.msra.mxu1 %v2287_v18 }
 0x121   :  { %581 = vmatprep.subr.mxu0 %v2223_v7  ;;  %652 = vmatprep.subr.mxu1 %v2292_v19 }
 0x122   :  { %582 = vmatpush1.msra.mxu0 %v2229_v8  ;;  %653 = vmatpush1.msra.mxu1 %v2304_v21 }
 0x123   :  { %583 = vmatprep.subr.mxu0 %v2240_v10  ;;  %654 = vmatprep.subr.mxu1 %v2316_v23 }
 0x124   :  { %584 = vmatpush1.msra.mxu0 %v2252_v12  ;;  %655 = vmatpush1.msra.mxu1 %v2328_v25 }
 0x125   :  { %585 = vmatprep.subr.mxu0 %v2269_v15  ;;  %656 = vmatprep.subr.mxu1 %v2340_v27 }
 0x126   :  { %586 = vmatpush1.msra.mxu0 %v2281_v17  ;;  %657 = vmatpush1.msra.mxu1 %v2352_v29  ;;  %v3641_v17 = vld [vmem:[#allocation11_spill] sm:$0xff] }
 0x127   :  { %587 = vmatprep.subr.mxu0 %v2298_v20  ;;  %658 = vmatprep.subr.mxu1 %v2364_v31  ;;  %v3642_v20 = vld [vmem:[#allocation6_spill] sm:$0xff] }
 0x128   :  { %588 = vmatpush1.msra.mxu0 %v2310_v22  ;;  %659 = vmatpush1.msra.mxu1 %v2376_v33  ;;  %v3643_v22 = vld [vmem:[#allocation13_spill] sm:$0xff] }
 0x129   :  { %589 = vmatprep.subr.mxu0 %v2322_v24  ;;  %660 = vmatprep.subr.mxu1 %v2388_v35  ;;  %v3644_v24 = vld [vmem:[#allocation7_spill] sm:$0xff] }
 0x12a   :  { %590 = vmatpush1.msra.mxu0 %v2334_v26  ;;  %661 = vmatpush1.msra.mxu1 %v2400_v37  ;;  %v3645_v26 = vld [vmem:[#allocation15_spill] sm:$0xff] }
 0x12b   :  { %591 = vmatprep.subr.mxu0 %v2346_v28  ;;  %662 = vmatprep.subr.mxu1 %v2412_v39  ;;  %v3646_v28 = vld [vmem:[#allocation8_spill] sm:$0xff] }
 0x12c   :  { %592 = vmatpush1.msra.mxu0 %v2358_v30  ;;  %663 = vmatpush1.msra.mxu1 %v2424_v41  ;;  %v3647_v30 = vld [vmem:[#allocation16_spill] sm:$0xff] }
 0x12d   :  { %593 = vmatprep.subr.mxu0 %v2370_v32  ;;  %664 = vmatprep.subr.mxu1 %v2436_v43  ;;  %v3648_v32 = vld [vmem:[#allocation9_spill] sm:$0xff] }
 0x12e   :  { %594 = vmatpush1.msra.mxu0 %v2382_v34  ;;  %665 = vmatpush1.msra.mxu1 %v2448_v45  ;;  %v3649_v34 = vld [vmem:[#allocation17_spill] sm:$0xff] }
 0x12f   :  { %595 = vmatprep.subr.mxu0 %v2394_v36  ;;  %666 = vmatprep.subr.mxu1 %v2460_v47  ;;  %v3650_v36 = vld [vmem:[#allocation10_spill] sm:$0xff] }
 0x130   :  { %596 = vmatpush1.msra.mxu0 %v2406_v38  ;;  %667 = vmatpush1.msra.mxu1 %v2472_v49  ;;  %v3651_v38 = vld [vmem:[#allocation18_spill] sm:$0xff] }
 0x131   :  { %597 = vmatprep.subr.mxu0 %v2418_v40  ;;  %668 = vmatprep.subr.mxu1 %v2484_v51  ;;  %v3652_v40 = vld [vmem:[#allocation12_spill] sm:$0xff] }
 0x132   :  { %598 = vmatpush1.msra.mxu0 %v2430_v42  ;;  %669 = vmatpush1.msra.mxu1 %v2496_v53  ;;  %v3653_v42 = vld [vmem:[#allocation19_spill] sm:$0xff] }
 0x133   :  { %599 = vmatprep.subr.mxu0 %v2442_v44  ;;  %670 = vmatprep.subr.mxu1 %v3641_v17  ;;  %v3654_v44 = vld [vmem:[#allocation14_spill] sm:$0xff] }
 0x134   :  { %600 = vmatpush1.msra.mxu0 %v3642_v20  ;;  %671 = vmatpush1.msra.mxu1 %v3643_v22  ;;  %v1974_v20 = vld [vmem:[%s3552_s0 + $0x30] sm:$0xff] }
 0x135   :  { %601 = vmatprep.subr.mxu0 %v3644_v24  ;;  %672 = vmatprep.subr.mxu1 %v3645_v26 }
 0x136   :  { %602 = vmatpush1.msra.mxu0 %v3646_v28  ;;  %673 = vmatpush1.msra.mxu1 %v3647_v30 }
 0x137   :  { %603 = vmatprep.subr.mxu0 %v3648_v32  ;;  %674 = vmatprep.subr.mxu1 %v3649_v34 }
 0x138   :  { %604 = vmatpush1.msra.mxu0 %v3650_v36  ;;  %675 = vmatpush1.msra.mxu1 %v3651_v38 }
 0x139   :  { %605 = vmatprep.subr.mxu0 %v3652_v40  ;;  %676 = vmatprep.subr.mxu1 %v3653_v42 }
 0x13a   :  { %606 = vmatpush1.msra.mxu0 %v3654_v44  ;;  %639 = vmatprep.mubr.f32.mxu0 %v3655_v46 }
 0x13b   :  { %677 = vmatpush1.msra.mxu1 %v3656_v55  ;;  %710 = vmatprep.mubr.f32.mxu1 %v3655_v46 }
 0x13c   :  { %816 = vmatprep.subr.mxu0 %v3657_v61  ;;  %887 = vmatprep.subr.mxu1 %v3658_v54 }
 0x1db   :  { %v400_v62 = vpop.f32.mrf.mxu0  ;;  %v471_v0 = vpop.f32.mrf.mxu1 }
 0x1dc   :  { %v476_v48 = vadd.f32 %v1972_v56, %v400_v62  ;;  %v478_v32 = vadd.f32 %v1974_v20, %v471_v0 }
 0x1dd   :  { %v402_v52 = vpop.f32.mrf.mxu0  ;;  %v473_v58 = vpop.f32.mrf.mxu1 }
 0x1de   :  { %v1976_v63 = vmul.f32 -1.442695, %v476_v48  ;;  %v477_v60 = vadd.f32 %v1973_v3, %v402_v52  ;;  %v479_v59 = vadd.f32 %v1975_v57, %v473_v58 }
 0x1e0   :  { %2046 = vpow2.f32 %v1976_v63  ;;  %v1977_v9 = vmul.f32 -1.442695, %v477_v60  ;;  %v1978_v24 = vmul.f32 -1.442695, %v479_v59 }
 0x1e2   :  { %2048 = vpow2.f32 %v1977_v9 }
 0x1e3   :  { %2050 = vpow2.f32 %v1978_v24 }
 0x1ed   :  { %v2047_v28 = vpop.eup %2046 }
 0x1ee   :  { %v483_v36 = vadd.f32 1.0, %v2047_v28 }
 0x1ef   :  { %v2049_v40 = vpop.eup %2048 }
 0x1f0   :  { %2052 = vrcp.f32 %v483_v36  ;;  %v489_v44 = vadd.f32 1.0, %v2049_v40  ;;  %v2051_v61 = vpop.eup %2050 }
 0x1f1   :  { %2054 = vtanh.f32 %v478_v32  ;;  %v496_v3 = vadd.f32 1.0, %v2051_v61  ;;  %v2945_v61 = vld [vmem:[%s3550_s2 + $0x1f8] sm:$0xff] }
 0x1f2   :  { %2056 = vrcp.f32 %v489_v44  ;;  %v2940_v44 = vld [vmem:[%s3550_s2 + $0x1e8] sm:$0xff]  ;;  %3668 = vst [vmem:[#allocation10_spill] sm:$0xff] %v2945_v61 }
 0x1f3   :  { %2058 = vrcp.f32 %v496_v3  ;;  %3667 = vst [vmem:[#allocation17_spill] sm:$0xff] %v2940_v44  ;;  %v2969_v3 = vld [vmem:[%s3550_s2 + $0x1d8] sm:$0xff] }
 0x1fd   :  { %v2053_v54 = vpop.eup %2052 }
 0x1fe   :  { %v2055_v56 = vpop.eup %2054 }
 0x1ff   :  { %v2057_v62 = vpop.eup %2056  ;;  %v500_v48 = vmul.f32 %v2055_v56, %v2053_v54  ;;  %v2952_v54 = vld [vmem:[%s3550_s2 + $0x1e0] sm:$0xff]  ;;  %v2957_v56 = vld [vmem:[%s3550_s2 + $0x1f0] sm:$0xff] }
 0x200   :  { %v499_v52 = vmul.f32 %v2057_v62, %v2656_v50  ;;  %v2059_v60 = vpop.eup %2058  ;;  %v1982_v50 = vld [vmem:[%s3552_s0 + $0x50] sm:$0xff]  ;;  %v2964_v62 = vld [vmem:[%s3550_s2 + $0x1c8] sm:$0xff] }
 0x202   :  { %v2741_v63 = vadd.f32 %v500_v48, %v499_v52  ;;  %v2976_v48 = vld [vmem:[%s3550_s2 + $0x1c0] sm:$0xff]  ;;  %v2981_v52 = vld [vmem:[%s3550_s2 + $0x1d0] sm:$0xff] }
 0x204   :  { %2060 = vtanh.f32 %v2741_v63 }
 0x211   :  { %v2061_v0 = vpop.eup %2060 }
 0x212   :  { %v503_v9 = vmul.f32 %v2061_v0, %v2059_v60  ;;  %v2993_v60 = vld [vmem:[%s3550_s2 + $0x1b8] sm:$0xff]  ;;  %v3000_v0 = vld [vmem:[%s3550_s2 + $0x1a0] sm:$0xff] }
 0x214   :  { %1979 = vst [vmem:[%s3553_s3 + $0x8] sm:$0xff] %v503_v9  ;;  %640 = vmatmul.mubr.f32.vlgmr.msra.gmra.mxu0 %v503_v9  ;;  %711 = vmatmul.mubr.f32.vlgmr.msra.gmra.mxu1 %v503_v9  ;;  %v3005_v9 = vld [vmem:[%s3550_s2 + $0x1b0] sm:$0xff] }
 0x215   :  { %817 = vmatpush1.msra.mxu0 %v2192_v1  ;;  %888 = vmatpush1.msra.mxu1 %v2246_v11  ;;  %v2793_v1 = vld [vmem:[%s3550_s2 + $0x140] sm:$0xff] }
 0x216   :  { %818 = vmatprep.subr.mxu0 %v2197_v2  ;;  %889 = vmatprep.subr.mxu1 %v2258_v13  ;;  %v2799_v2 = vld [vmem:[%s3550_s2 + $0x128] sm:$0xff]  ;;  %v2839_v11 = vld [vmem:[%s3550_s2 + $0xc0] sm:$0xff] }
 0x217   :  { %819 = vmatpush1.msra.mxu0 %v2205_v4  ;;  %890 = vmatpush1.msra.mxu1 %v2263_v14  ;;  %v2805_v4 = vld [vmem:[%s3550_s2 + $0x120] sm:$0xff]  ;;  %v2857_v14 = vld [vmem:[%s3550_s2 + $0x88] sm:$0xff] }
 0x218   :  { %820 = vmatprep.subr.mxu0 %v2211_v5  ;;  %891 = vmatprep.subr.mxu1 %v2275_v16  ;;  %v2811_v5 = vld [vmem:[%s3550_s2 + $0x108] sm:$0xff]  ;;  %v2851_v13 = vld [vmem:[%s3550_s2 + $0xa0] sm:$0xff] }
 0x219   :  { %821 = vmatpush1.msra.mxu0 %v2217_v6  ;;  %892 = vmatpush1.msra.mxu1 %v2287_v18  ;;  %v2816_v6 = vld [vmem:[%s3550_s2 + $0x100] sm:$0xff]  ;;  %v2869_v16 = vld [vmem:[%s3550_s2 + $0x68] sm:$0xff] }
 0x21a   :  { %822 = vmatprep.subr.mxu0 %v2223_v7  ;;  %893 = vmatprep.subr.mxu1 %v2292_v19  ;;  %v2821_v7 = vld [vmem:[%s3550_s2 + $0xe8] sm:$0xff]  ;;  %3659 = vst [vmem:[#allocation11_spill] sm:$0xff] %v2869_v16  ;;  %v2875_v18 = vld [vmem:[%s3550_s2 + $0x60] sm:$0xff] }
 0x21b   :  { %823 = vmatpush1.msra.mxu0 %v2229_v8  ;;  %894 = vmatpush1.msra.mxu1 %v2304_v21  ;;  %v2827_v8 = vld [vmem:[%s3550_s2 + $0xe0] sm:$0xff]  ;;  %3660 = vst [vmem:[#allocation6_spill] sm:$0xff] %v2875_v18  ;;  %v2881_v19 = vld [vmem:[%s3550_s2 + $0x48] sm:$0xff] }
 0x21c   :  { %824 = vmatprep.subr.mxu0 %v2240_v10  ;;  %895 = vmatprep.subr.mxu1 %v2316_v23  ;;  %v2833_v10 = vld [vmem:[%s3550_s2 + $0xc8] sm:$0xff]  ;;  %3661 = vst [vmem:[#allocation13_spill] sm:$0xff] %v2881_v19  ;;  %v2887_v21 = vld [vmem:[%s3550_s2 + $0x40] sm:$0xff] }
 0x21d   :  { %825 = vmatpush1.msra.mxu0 %v2252_v12  ;;  %896 = vmatpush1.msra.mxu1 %v2328_v25  ;;  %v2845_v12 = vld [vmem:[%s3550_s2 + $0xa8] sm:$0xff]  ;;  %3662 = vst [vmem:[#allocation7_spill] sm:$0xff] %v2887_v21  ;;  %v2899_v25 = vld [vmem:[%s3550_s2 + $0x20] sm:$0xff] }
 0x21e   :  { %826 = vmatprep.subr.mxu0 %v2269_v15  ;;  %897 = vmatprep.subr.mxu1 %v2340_v27  ;;  %v2863_v15 = vld [vmem:[%s3550_s2 + $0x80] sm:$0xff]  ;;  %v2893_v23 = vld [vmem:[%s3550_s2 + $0x28] sm:$0xff]  ;;  %3664 = vst [vmem:[#allocation8_spill] sm:$0xff] %v2899_v25 }
 0x21f   :  { %898 = vmatpush1.msra.mxu1 %v2352_v29  ;;  %880 = vmatprep.mubr.f32.mxu0 %v3655_v46  ;;  %3663 = vst [vmem:[#allocation15_spill] sm:$0xff] %v2893_v23  ;;  %v2905_v27 = vld [vmem:[%s3550_s2 + $0x8] sm:$0xff]  ;;  %v2911_v29 = vld [vmem:[%s3550_s2] sm:$0xff] }
 0x220   :  { %899 = vmatprep.subr.mxu1 %v2364_v31  ;;  %951 = vmatprep.mubr.f32.mxu1 %v3655_v46  ;;  %3665 = vst [vmem:[#allocation16_spill] sm:$0xff] %v2905_v27  ;;  %3666 = vst [vmem:[#allocation9_spill] sm:$0xff] %v2911_v29  ;;  %v1980_v31 = vld [vmem:[%s3552_s0 + $0x40] sm:$0xff] }
 0x221   :  { %900 = vmatpush1.msra.mxu1 %v2376_v33  ;;  %827 = vmatpush1.msra.mxu0 %v2793_v1 }
 0x222   :  { %901 = vmatprep.subr.mxu1 %v2388_v35  ;;  %828 = vmatprep.subr.mxu0 %v2799_v2  ;;  %v1981_v35 = vld [vmem:[%s3552_s0 + $0x48] sm:$0xff] }
 0x223   :  { %902 = vmatpush1.msra.mxu1 %v2400_v37  ;;  %829 = vmatpush1.msra.mxu0 %v2805_v4 }
 0x224   :  { %903 = vmatprep.subr.mxu1 %v2412_v39  ;;  %830 = vmatprep.subr.mxu0 %v2811_v5 }
 0x225   :  { %904 = vmatpush1.msra.mxu1 %v2424_v41  ;;  %831 = vmatpush1.msra.mxu0 %v2816_v6 }
 0x226   :  { %905 = vmatprep.subr.mxu1 %v2436_v43  ;;  %832 = vmatprep.subr.mxu0 %v2821_v7 }
 0x227   :  { %906 = vmatpush1.msra.mxu1 %v2448_v45  ;;  %833 = vmatpush1.msra.mxu0 %v2827_v8 }
 0x228   :  { %907 = vmatprep.subr.mxu1 %v2460_v47  ;;  %834 = vmatprep.subr.mxu0 %v2833_v10 }
 0x229   :  { %908 = vmatpush1.msra.mxu1 %v2472_v49  ;;  %835 = vmatpush1.msra.mxu0 %v2839_v11  ;;  %v1983_v49 = vld [vmem:[%s3552_s0 + $0x58] sm:$0xff] }
 0x22a   :  { %909 = vmatprep.subr.mxu1 %v2484_v51  ;;  %836 = vmatprep.subr.mxu0 %v2845_v12 }
 0x22b   :  { %910 = vmatpush1.msra.mxu1 %v2496_v53  ;;  %837 = vmatpush1.msra.mxu0 %v2851_v13 }
 0x22c   :  { %911 = vmatprep.subr.mxu1 %v3641_v17  ;;  %838 = vmatprep.subr.mxu0 %v2857_v14 }
 0x22d   :  { %912 = vmatpush1.msra.mxu1 %v3643_v22  ;;  %839 = vmatpush1.msra.mxu0 %v2863_v15 }
 0x22e   :  { %913 = vmatprep.subr.mxu1 %v3645_v26  ;;  %840 = vmatprep.subr.mxu0 %v2869_v16 }
 0x22f   :  { %914 = vmatpush1.msra.mxu1 %v3647_v30  ;;  %841 = vmatpush1.msra.mxu0 %v2875_v18 }
 0x230   :  { %915 = vmatprep.subr.mxu1 %v3649_v34  ;;  %842 = vmatprep.subr.mxu0 %v2881_v19 }
 0x231   :  { %916 = vmatpush1.msra.mxu1 %v3651_v38  ;;  %843 = vmatpush1.msra.mxu0 %v2887_v21 }
 0x232   :  { %917 = vmatprep.subr.mxu1 %v3653_v42  ;;  %844 = vmatprep.subr.mxu0 %v2893_v23 }
 0x233   :  { %918 = vmatpush1.msra.mxu1 %v3656_v55  ;;  %845 = vmatpush1.msra.mxu0 %v2899_v25 }
 0x234   :  { %846 = vmatprep.subr.mxu0 %v2905_v27  ;;  %1128 = vmatprep.subr.mxu1 %v2945_v61 }
 0x235   :  { %847 = vmatpush1.msra.mxu0 %v2911_v29 }
 0x236   :  { %1057 = vmatprep.subr.mxu0 %v2940_v44 }
 0x2d4   :  { %v641_v33 = vpop.f32.mrf.mxu0  ;;  %v712_v45 = vpop.f32.mrf.mxu1 }
 0x2d5   :  { %v717_v37 = vadd.f32 %v1980_v31, %v641_v33  ;;  %v719_v26 = vadd.f32 %v1982_v50, %v712_v45  ;;  %v3012_v31 = vld [vmem:[%s3550_s2 + $0x188] sm:$0xff]  ;;  %v3017_v33 = vld [vmem:[%s3550_s2 + $0x198] sm:$0xff]  ;;  %v3053_v45 = vld [vmem:[%s3550_s2 + $0x170] sm:$0xff] }
 0x2d6   :  { %v643_v39 = vpop.f32.mrf.mxu0  ;;  %v714_v51 = vpop.f32.mrf.mxu1  ;;  %v3086_v50 = vld [vmem:[%s3550_s2 + $0x130] sm:$0xff] }
 0x2d7   :  { %v1984_v41 = vmul.f32 -1.442695, %v717_v37  ;;  %v718_v43 = vadd.f32 %v1981_v35, %v643_v39  ;;  %v720_v53 = vadd.f32 %v1983_v49, %v714_v51  ;;  %v3024_v35 = vld [vmem:[%s3550_s2 + $0x180] sm:$0xff]  ;;  %v3029_v37 = vld [vmem:[%s3550_s2 + $0x190] sm:$0xff]  ;;  %v3036_v39 = vld [vmem:[%s3550_s2 + $0x168] sm:$0xff] }
 0x2d8   :  { %v3065_v49 = vld [vmem:[%s3550_s2 + $0x158] sm:$0xff]  ;;  %v3072_v51 = vld [vmem:[%s3550_s2 + $0x150] sm:$0xff] }
 0x2d9   :  { %2062 = vpow2.f32 %v1984_v41  ;;  %v1985_v47 = vmul.f32 -1.442695, %v718_v43  ;;  %v1986_v17 = vmul.f32 -1.442695, %v720_v53  ;;  %v3041_v41 = vld [vmem:[%s3550_s2 + $0x178] sm:$0xff]  ;;  %v3048_v43 = vld [vmem:[%s3550_s2 + $0x160] sm:$0xff] }
 0x2da   :  { %v3079_v53 = vld [vmem:[%s3550_s2 + $0x138] sm:$0xff] }
 0x2db   :  { %2064 = vpow2.f32 %v1985_v47  ;;  %v3060_v47 = vld [vmem:[%s3550_s2 + $0x148] sm:$0xff] }
 0x2dc   :  { %2066 = vpow2.f32 %v1986_v17  ;;  %v3093_v17 = vld [vmem:[%s3550_s2 + $0x118] sm:$0xff] }
 0x2e6   :  { %v2063_v22 = vpop.eup %2062 }
 0x2e7   :  { %v724_v30 = vadd.f32 1.0, %v2063_v22  ;;  %v3098_v22 = vld [vmem:[%s3550_s2 + $0x110] sm:$0xff] }
 0x2e8   :  { %v2065_v34 = vpop.eup %2064 }
 0x2e9   :  { %2068 = vrcp.f32 %v724_v30  ;;  %v730_v38 = vadd.f32 1.0, %v2065_v34  ;;  %v2067_v42 = vpop.eup %2066  ;;  %v3110_v30 = vld [vmem:[%s3550_s2 + $0xf0] sm:$0xff]  ;;  %v3117_v34 = vld [vmem:[%s3550_s2 + $0xd8] sm:$0xff] }
 0x2ea   :  { %2070 = vtanh.f32 %v719_v26  ;;  %v737_v59 = vadd.f32 1.0, %v2067_v42  ;;  %v3103_v26 = vld [vmem:[%s3550_s2 + $0xf8] sm:$0xff] }
 0x2eb   :  { %2072 = vrcp.f32 %v730_v38  ;;  %v3124_v38 = vld [vmem:[%s3550_s2 + $0xd0] sm:$0xff]  ;;  %v3131_v42 = vld [vmem:[%s3550_s2 + $0xb8] sm:$0xff] }
 0x2ec   :  { %2074 = vrcp.f32 %v737_v59  ;;  %v3159_v59 = vld [vmem:[%s3550_s2 + $0x78] sm:$0xff] }
 0x2ed   :  { %3669 = vst [vmem:[#allocation18_spill] sm:$0xff] %v3159_v59 }
 0x2f6   :  { %v2069_v55 = vpop.eup %2068 }
 0x2f7   :  { %v2071_v57 = vpop.eup %2070 }
 0x2f8   :  { %v2073_v58 = vpop.eup %2072  ;;  %v741_v20 = vmul.f32 %v2071_v57, %v2069_v55  ;;  %v3138_v55 = vld [vmem:[%s3550_s2 + $0xb0] sm:$0xff]  ;;  %v3145_v57 = vld [vmem:[%s3550_s2 + $0x98] sm:$0xff] }
 0x2f9   :  { %v740_v24 = vmul.f32 %v2073_v58, %v2741_v63  ;;  %v2075_v32 = vpop.eup %2074  ;;  %v2988_v63 = vld [vmem:[%s3550_s2 + $0x1a8] sm:$0xff]  ;;  %v3152_v58 = vld [vmem:[%s3550_s2 + $0x90] sm:$0xff] }
 0x2fb   :  { %v2929_v28 = vadd.f32 %v741_v20, %v740_v24  ;;  %v3166_v20 = vld [vmem:[%s3550_s2 + $0x70] sm:$0xff]  ;;  %v3173_v24 = vld [vmem:[%s3550_s2 + $0x58] sm:$0xff] }
 0x2fc   :  { %3670 = vst [vmem:[#allocation12_spill] sm:$0xff] %v3166_v20  ;;  %3671 = vst [vmem:[#allocation19_spill] sm:$0xff] %v3173_v24 }
 0x2fd   :  { %2076 = vtanh.f32 %v2929_v28 }
 0x30a   :  { %v2077_v36 = vpop.eup %2076 }
 0x30b   :  { %v744_v40 = vmul.f32 %v2077_v36, %v2075_v32  ;;  %v3180_v32 = vld [vmem:[%s3550_s2 + $0x50] sm:$0xff]  ;;  %v3187_v36 = vld [vmem:[%s3550_s2 + $0x38] sm:$0xff] }
 0x30c   :  { %3672 = vst [vmem:[#allocation14_spill] sm:$0xff] %v3180_v32  ;;  %3673 = vst [vmem:[#allocation20_spill] sm:$0xff] %v3187_v36 }
 0x30d   :  { %1987 = vst [vmem:[%s3553_s3 + $0x10] sm:$0xff] %v744_v40  ;;  %881 = vmatmul.mubr.f32.vlgmr.msra.gmra.mxu0 %v744_v40  ;;  %952 = vmatmul.mubr.f32.vlgmr.msra.gmra.mxu1 %v744_v40  ;;  %v3194_v40 = vld [vmem:[%s3550_s2 + $0x30] sm:$0xff] }
 0x30e   :  { %1121 = vmatprep.mubr.f32.mxu0 %v3655_v46  ;;  %1192 = vmatprep.mubr.f32.mxu1 %v3655_v46  ;;  %3674 = vst [vmem:[#allocation4_spill] sm:$0xff] %v3194_v40  ;;  %v3201_v46 = vld [vmem:[%s3550_s2 + $0x18] sm:$0xff] }
 0x30f   :  { %1058 = vmatpush1.msra.mxu0 %v2952_v54  ;;  %1129 = vmatpush1.msra.mxu1 %v2957_v56  ;;  %3675 = vst [vmem:[#allocation5_spill] sm:$0xff] %v3201_v46 }
 0x310   :  { %1059 = vmatprep.subr.mxu0 %v2964_v62  ;;  %1130 = vmatprep.subr.mxu1 %v2969_v3 }
 0x311   :  { %1060 = vmatpush1.msra.mxu0 %v2976_v48  ;;  %1131 = vmatpush1.msra.mxu1 %v2981_v52 }
 0x312   :  { %1061 = vmatprep.subr.mxu0 %v2988_v63  ;;  %1132 = vmatprep.subr.mxu1 %v2993_v60 }
 0x313   :  { %1062 = vmatpush1.msra.mxu0 %v3000_v0  ;;  %1133 = vmatpush1.msra.mxu1 %v3005_v9 }
 0x314   :  { %1063 = vmatprep.subr.mxu0 %v3012_v31  ;;  %1134 = vmatprep.subr.mxu1 %v3017_v33 }
 0x315   :  { %1064 = vmatpush1.msra.mxu0 %v3024_v35  ;;  %1135 = vmatpush1.msra.mxu1 %v3029_v37 }
 0x316   :  { %1065 = vmatprep.subr.mxu0 %v3036_v39  ;;  %1136 = vmatprep.subr.mxu1 %v3041_v41 }
 0x317   :  { %1066 = vmatpush1.msra.mxu0 %v3048_v43  ;;  %1137 = vmatpush1.msra.mxu1 %v3053_v45 }
 0x318   :  { %1067 = vmatprep.subr.mxu0 %v3060_v47  ;;  %1138 = vmatprep.subr.mxu1 %v3065_v49 }
 0x319   :  { %1068 = vmatpush1.msra.mxu0 %v2793_v1  ;;  %1139 = vmatpush1.msra.mxu1 %v3072_v51 }
 0x31a   :  { %1069 = vmatprep.subr.mxu0 %v2799_v2  ;;  %1140 = vmatprep.subr.mxu1 %v3079_v53 }
 0x31b   :  { %1070 = vmatpush1.msra.mxu0 %v2805_v4  ;;  %1141 = vmatpush1.msra.mxu1 %v3086_v50 }
 0x31c   :  { %1071 = vmatprep.subr.mxu0 %v2811_v5  ;;  %1142 = vmatprep.subr.mxu1 %v3093_v17 }
 0x31d   :  { %1072 = vmatpush1.msra.mxu0 %v2816_v6  ;;  %1143 = vmatpush1.msra.mxu1 %v3098_v22 }
 0x31e   :  { %1073 = vmatprep.subr.mxu0 %v2821_v7  ;;  %1144 = vmatprep.subr.mxu1 %v3103_v26 }
 0x31f   :  { %1074 = vmatpush1.msra.mxu0 %v2827_v8  ;;  %1145 = vmatpush1.msra.mxu1 %v3110_v30 }
 0x320   :  { %1075 = vmatprep.subr.mxu0 %v2833_v10  ;;  %1146 = vmatprep.subr.mxu1 %v3117_v34 }
 0x321   :  { %1076 = vmatpush1.msra.mxu0 %v2839_v11  ;;  %1147 = vmatpush1.msra.mxu1 %v3124_v38 }
 0x322   :  { %1077 = vmatprep.subr.mxu0 %v2845_v12  ;;  %1148 = vmatprep.subr.mxu1 %v3131_v42 }
 0x323   :  { %1078 = vmatpush1.msra.mxu0 %v2851_v13  ;;  %1149 = vmatpush1.msra.mxu1 %v3138_v55 }
 0x324   :  { %1079 = vmatprep.subr.mxu0 %v2857_v14  ;;  %1150 = vmatprep.subr.mxu1 %v3145_v57 }
 0x325   :  { %1080 = vmatpush1.msra.mxu0 %v2863_v15  ;;  %1151 = vmatpush1.msra.mxu1 %v3152_v58 }
 0x326   :  { %1081 = vmatprep.subr.mxu0 %v2869_v16  ;;  %1152 = vmatprep.subr.mxu1 %v3159_v59 }
 0x327   :  { %1082 = vmatpush1.msra.mxu0 %v2875_v18  ;;  %1153 = vmatpush1.msra.mxu1 %v3166_v20 }
 0x328   :  { %1083 = vmatprep.subr.mxu0 %v2881_v19  ;;  %1154 = vmatprep.subr.mxu1 %v3173_v24  ;;  %v3208_v24 = vld [vmem:[%s3550_s2 + $0x10] sm:$0xff] }
 0x329   :  { %1084 = vmatpush1.msra.mxu0 %v2887_v21  ;;  %1155 = vmatpush1.msra.mxu1 %v3180_v32  ;;  %3676 = vst [vmem:[#allocation21_spill] sm:$0xff] %v3208_v24  ;;  %v1990_v19 = vld [vmem:[%s3552_s0 + $0x70] sm:$0xff] }
 0x32a   :  { %1085 = vmatprep.subr.mxu0 %v2893_v23  ;;  %1156 = vmatprep.subr.mxu1 %v3187_v36  ;;  %v1988_v36 = vld [vmem:[%s3552_s0 + $0x60] sm:$0xff] }
 0x32b   :  { %1086 = vmatpush1.msra.mxu0 %v2899_v25  ;;  %1157 = vmatpush1.msra.mxu1 %v3194_v40  ;;  %v1989_v40 = vld [vmem:[%s3552_s0 + $0x68] sm:$0xff] }
 0x32c   :  { %1087 = vmatprep.subr.mxu0 %v2905_v27  ;;  %1158 = vmatprep.subr.mxu1 %v3201_v46 }
 0x32d   :  { %1088 = vmatpush1.msra.mxu0 %v2911_v29  ;;  %1159 = vmatpush1.msra.mxu1 %v3208_v24 }
 0x32e   :  { %1298 = vmatprep.subr.mxu0 %v2940_v44  ;;  %1369 = vmatprep.subr.mxu1 %v2945_v61  ;;  %v1991_v61 = vld [vmem:[%s3552_s0 + $0x78] sm:$0xff] }
 0x3cd   :  { %v882_v23 = vpop.f32.mrf.mxu0  ;;  %v953_v29 = vpop.f32.mrf.mxu1 }
 0x3ce   :  { %v958_v27 = vadd.f32 %v1988_v36, %v882_v23  ;;  %v960_v23 = vadd.f32 %v1990_v19, %v953_v29  ;;  %v3677_v29 = vld [vmem:[#allocation11_spill] sm:$0xff] }
 0x3cf   :  { %v884_v25 = vpop.f32.mrf.mxu0  ;;  %v955_v44 = vpop.f32.mrf.mxu1 }
 0x3d0   :  { %v1992_v46 = vmul.f32 -1.442695, %v958_v27  ;;  %v959_v32 = vadd.f32 %v1989_v40, %v884_v25  ;;  %v961_v21 = vadd.f32 %v1991_v61, %v955_v44 }
 0x3d2   :  { %2078 = vpow2.f32 %v1992_v46  ;;  %v1993_v24 = vmul.f32 -1.442695, %v959_v32  ;;  %v1994_v20 = vmul.f32 -1.442695, %v961_v21 }
 0x3d4   :  { %2080 = vpow2.f32 %v1993_v24 }
 0x3d5   :  { %2082 = vpow2.f32 %v1994_v20  ;;  %v3680_v20 = vld [vmem:[#allocation12_spill] sm:$0xff] }
 0x3df   :  { %v2079_v18 = vpop.eup %2078 }
 0x3e0   :  { %v965_v36 = vadd.f32 1.0, %v2079_v18 }
 0x3e1   :  { %v2081_v27 = vpop.eup %2080 }
 0x3e2   :  { %2084 = vrcp.f32 %v965_v36  ;;  %v971_v46 = vadd.f32 1.0, %v2081_v27  ;;  %v2083_v25 = vpop.eup %2082  ;;  %v3682_v36 = vld [vmem:[#allocation19_spill] sm:$0xff] }
 0x3e3   :  { %2086 = vtanh.f32 %v960_v23  ;;  %v978_v59 = vadd.f32 1.0, %v2083_v25  ;;  %v3681_v23 = vld [vmem:[#allocation13_spill] sm:$0xff]  ;;  %v3683_v27 = vld [vmem:[#allocation7_spill] sm:$0xff] }
 0x3e4   :  { %2088 = vrcp.f32 %v971_v46  ;;  %v3684_v46 = vld [vmem:[#allocation14_spill] sm:$0xff]  ;;  %v3685_v25 = vld [vmem:[#allocation15_spill] sm:$0xff] }
 0x3e5   :  { %2090 = vrcp.f32 %v978_v59  ;;  %v3679_v59 = vld [vmem:[#allocation6_spill] sm:$0xff] }
 0x3ef   :  { %v2085_v24 = vpop.eup %2084 }
 0x3f0   :  { %v2087_v32 = vpop.eup %2086 }
 0x3f1   :  { %v2089_v40 = vpop.eup %2088  ;;  %v982_v44 = vmul.f32 %v2087_v32, %v2085_v24  ;;  %v3686_v24 = vld [vmem:[#allocation20_spill] sm:$0xff] }
 0x3f2   :  { %v981_v61 = vmul.f32 %v2089_v40, %v2929_v28  ;;  %v2091_v18 = vpop.eup %2090  ;;  %v3678_v28 = vld [vmem:[#allocation18_spill] sm:$0xff]  ;;  %v3687_v32 = vld [vmem:[#allocation8_spill] sm:$0xff] }
 0x3f3   :  { %v3688_v40 = vld [vmem:[#allocation4_spill] sm:$0xff] }
 0x3f4   :  { %v3231_v16 = vadd.f32 %v982_v44, %v981_v61  ;;  %v3689_v44 = vld [vmem:[#allocation16_spill] sm:$0xff]  ;;  %v3690_v61 = vld [vmem:[#allocation5_spill] sm:$0xff] }
 0x3f6   :  { %2092 = vtanh.f32 %v3231_v16 }
 0x403   :  { %v2093_v19 = vpop.eup %2092 }
 0x404   :  { %v985_v21 = vmul.f32 %v2093_v19, %v2091_v18  ;;  %v3691_v18 = vld [vmem:[#allocation9_spill] sm:$0xff]  ;;  %v3692_v19 = vmov 0.0  }
 0x406   :  { %1995 = vst [vmem:[%s3553_s3 + $0x18] sm:$0xff] %v985_v21  ;;  %1122 = vmatmul.mubr.f32.vlgmr.msra.gmra.mxu0 %v985_v21  ;;  %1193 = vmatmul.mubr.f32.vlgmr.msra.gmra.mxu1 %v985_v21  ;;  %v3693_v21 = vld [vmem:[#allocation21_spill] sm:$0xff] }
 0x407   :  { %1299 = vmatpush1.msra.mxu0 %v2952_v54  ;;  %1370 = vmatpush1.msra.mxu1 %v2957_v56 }
 0x408   :  { %1300 = vmatprep.subr.mxu0 %v2964_v62  ;;  %1371 = vmatprep.subr.mxu1 %v2969_v3 }
 0x409   :  { %1301 = vmatpush1.msra.mxu0 %v2976_v48  ;;  %1372 = vmatpush1.msra.mxu1 %v2981_v52 }
 0x40a   :  { %1302 = vmatprep.subr.mxu0 %v2988_v63  ;;  %1373 = vmatprep.subr.mxu1 %v2993_v60 }
 0x40b   :  { %1303 = vmatpush1.msra.mxu0 %v3000_v0  ;;  %1374 = vmatpush1.msra.mxu1 %v3005_v9 }
 0x40c   :  { %1304 = vmatprep.subr.mxu0 %v3012_v31  ;;  %1375 = vmatprep.subr.mxu1 %v3017_v33 }
 0x40d   :  { %1305 = vmatpush1.msra.mxu0 %v3024_v35  ;;  %1376 = vmatpush1.msra.mxu1 %v3029_v37 }
 0x40e   :  { %1306 = vmatprep.subr.mxu0 %v3036_v39  ;;  %1377 = vmatprep.subr.mxu1 %v3041_v41 }
 0x40f   :  { %1307 = vmatpush1.msra.mxu0 %v3048_v43  ;;  %1378 = vmatpush1.msra.mxu1 %v3053_v45 }
 0x410   :  { %1308 = vmatprep.subr.mxu0 %v3060_v47  ;;  %1379 = vmatprep.subr.mxu1 %v3065_v49 }
 0x411   :  { %1309 = vmatpush1.msra.mxu0 %v2793_v1  ;;  %1380 = vmatpush1.msra.mxu1 %v3072_v51 }
 0x412   :  { %1310 = vmatprep.subr.mxu0 %v2799_v2  ;;  %1381 = vmatprep.subr.mxu1 %v3079_v53 }
 0x413   :  { %1311 = vmatpush1.msra.mxu0 %v2805_v4  ;;  %1382 = vmatpush1.msra.mxu1 %v3086_v50 }
 0x414   :  { %1312 = vmatprep.subr.mxu0 %v2811_v5  ;;  %1383 = vmatprep.subr.mxu1 %v3093_v17 }
 0x415   :  { %1313 = vmatpush1.msra.mxu0 %v2816_v6  ;;  %1384 = vmatpush1.msra.mxu1 %v3098_v22 }
 0x416   :  { %1314 = vmatprep.subr.mxu0 %v2821_v7  ;;  %1385 = vmatprep.subr.mxu1 %v3103_v26 }
 0x417   :  { %1315 = vmatpush1.msra.mxu0 %v2827_v8  ;;  %1386 = vmatpush1.msra.mxu1 %v3110_v30 }
 0x418   :  { %1316 = vmatprep.subr.mxu0 %v2833_v10  ;;  %1387 = vmatprep.subr.mxu1 %v3117_v34 }
 0x419   :  { %1317 = vmatpush1.msra.mxu0 %v2839_v11  ;;  %1388 = vmatpush1.msra.mxu1 %v3124_v38 }
 0x41a   :  { %1318 = vmatprep.subr.mxu0 %v2845_v12  ;;  %1389 = vmatprep.subr.mxu1 %v3131_v42 }
 0x41b   :  { %1319 = vmatpush1.msra.mxu0 %v2851_v13  ;;  %1390 = vmatpush1.msra.mxu1 %v3138_v55 }
 0x41c   :  { %1320 = vmatprep.subr.mxu0 %v2857_v14  ;;  %1391 = vmatprep.subr.mxu1 %v3145_v57 }
 0x41d   :  { %1321 = vmatpush1.msra.mxu0 %v2863_v15  ;;  %1392 = vmatpush1.msra.mxu1 %v3152_v58 }
 0x41e   :  { %1322 = vmatprep.subr.mxu0 %v3677_v29  ;;  %1393 = vmatprep.subr.mxu1 %v3678_v28 }
 0x41f   :  { %1323 = vmatpush1.msra.mxu0 %v3679_v59  ;;  %1394 = vmatpush1.msra.mxu1 %v3680_v20 }
 0x420   :  { %1324 = vmatprep.subr.mxu0 %v3681_v23  ;;  %1395 = vmatprep.subr.mxu1 %v3682_v36  ;;  %v1998_v23 = vld [vmem:[%s3552_s0 + $0x90] sm:$0xff] }
 0x421   :  { %1325 = vmatpush1.msra.mxu0 %v3683_v27  ;;  %1396 = vmatpush1.msra.mxu1 %v3684_v46  ;;  %v3694_v46 = vld [vmem:[#allocation17_spill] sm:$0xff] }
 0x422   :  { %1326 = vmatprep.subr.mxu0 %v3685_v25  ;;  %1397 = vmatprep.subr.mxu1 %v3686_v24  ;;  %v3695_v25 = vld [vmem:[#allocation10_spill] sm:$0xff] }
 0x423   :  { %1327 = vmatpush1.msra.mxu0 %v3687_v32  ;;  %1398 = vmatpush1.msra.mxu1 %v3688_v40  ;;  %v1996_v40 = vld [vmem:[%s3552_s0 + $0x80] sm:$0xff] }
 0x424   :  { %1328 = vmatprep.subr.mxu0 %v3689_v44  ;;  %1399 = vmatprep.subr.mxu1 %v3690_v61  ;;  %v1997_v61 = vld [vmem:[%s3552_s0 + $0x88] sm:$0xff] }
 0x425   :  { %1329 = vmatpush1.msra.mxu0 %v3691_v18  ;;  %1362 = vmatprep.mubr.f32.mxu0 %v3692_v19 }
 0x426   :  { %1400 = vmatpush1.msra.mxu1 %v3693_v21  ;;  %1433 = vmatprep.mubr.f32.mxu1 %v3692_v19 }
 0x427   :  { %1539 = vmatprep.subr.mxu0 %v3694_v46  ;;  %1610 = vmatprep.subr.mxu1 %v3695_v25  ;;  %v1999_v25 = vld [vmem:[%s3552_s0 + $0x98] sm:$0xff] }
 0x4c6   :  { %v1123_v32 = vpop.f32.mrf.mxu0  ;;  %v1194_v21 = vpop.f32.mrf.mxu1 }
 0x4c7   :  { %v1199_v18 = vadd.f32 %v1996_v40, %v1123_v32  ;;  %v1201_v32 = vadd.f32 %v1998_v23, %v1194_v21  ;;  %v3712_v21 = vld [vmem:[#allocation21_spill] sm:$0xff] }
 0x4c8   :  { %v1125_v44 = vpop.f32.mrf.mxu0  ;;  %v1196_v46 = vpop.f32.mrf.mxu1 }
 0x4c9   :  { %v2000_v24 = vmul.f32 -1.442695, %v1199_v18  ;;  %v1200_v27 = vadd.f32 %v1997_v61, %v1125_v44  ;;  %v1202_v36 = vadd.f32 %v1999_v25, %v1196_v46 }
 0x4cb   :  { %2094 = vpow2.f32 %v2000_v24  ;;  %v2001_v19 = vmul.f32 -1.442695, %v1200_v27  ;;  %v2002_v20 = vmul.f32 -1.442695, %v1202_v36  ;;  %v3711_v36 = vmov 0.0  }
 0x4cd   :  { %2096 = vpow2.f32 %v2001_v19 }
 0x4ce   :  { %2098 = vpow2.f32 %v2002_v20 }
 0x4d8   :  { %v2095_v59 = vpop.eup %2094 }
 0x4d9   :  { %v1206_v40 = vadd.f32 1.0, %v2095_v59 }
 0x4da   :  { %v2097_v18 = vpop.eup %2096 }
 0x4db   :  { %2100 = vrcp.f32 %v1206_v40  ;;  %v1212_v24 = vadd.f32 1.0, %v2097_v18  ;;  %v2099_v27 = vpop.eup %2098  ;;  %v3714_v40 = vld [vmem:[#allocation10_spill] sm:$0xff]  ;;  %v2004_v18 = vld [vmem:[%s3552_s0 + $0xa0] sm:$0xff] }
 0x4dc   :  { %2102 = vtanh.f32 %v1201_v32  ;;  %v1219_v28 = vadd.f32 1.0, %v2099_v27  ;;  %v3713_v32 = vld [vmem:[#allocation17_spill] sm:$0xff] }
 0x4dd   :  { %2104 = vrcp.f32 %v1212_v24  ;;  %v2005_v27 = vld [vmem:[%s3552_s0 + $0xa8] sm:$0xff] }
 0x4de   :  { %2106 = vrcp.f32 %v1219_v28  ;;  %v3710_v28 = vld [vmem:[#allocation9_spill] sm:$0xff] }
 0x4e8   :  { %v2101_v44 = vpop.eup %2100 }
 0x4e9   :  { %v2103_v61 = vpop.eup %2102 }
 0x4ea   :  { %v2105_v19 = vpop.eup %2104  ;;  %v1223_v46 = vmul.f32 %v2103_v61, %v2101_v44 }
 0x4eb   :  { %v1222_v25 = vmul.f32 %v2105_v19, %v3231_v16  ;;  %v2107_v59 = vpop.eup %2106  ;;  %v3709_v16 = vld [vmem:[#allocation5_spill] sm:$0xff] }
 0x4ed   :  { %v3316_v29 = vadd.f32 %v1223_v46, %v1222_v25 }
 0x4ef   :  { %2108 = vtanh.f32 %v3316_v29 }
 0x4fc   :  { %v2109_v23 = vpop.eup %2108 }
 0x4fd   :  { %v1226_v20 = vmul.f32 %v2109_v23, %v2107_v59  ;;  %v2007_v23 = vld [vmem:[%s3552_s0 + $0xb8] sm:$0xff] }
 0x4ff   :  { %2003 = vst [vmem:[%s3553_s3 + $0x20] sm:$0xff] %v1226_v20  ;;  %1363 = vmatmul.mubr.f32.vlgmr.msra.gmra.mxu0 %v1226_v20  ;;  %1434 = vmatmul.mubr.f32.vlgmr.msra.gmra.mxu1 %v1226_v20 }
 0x500   :  { %1540 = vmatpush1.msra.mxu0 %v2952_v54  ;;  %1611 = vmatpush1.msra.mxu1 %v2957_v56 }
 0x501   :  { %1541 = vmatprep.subr.mxu0 %v2964_v62  ;;  %1612 = vmatprep.subr.mxu1 %v2969_v3 }
 0x502   :  { %1542 = vmatpush1.msra.mxu0 %v2976_v48  ;;  %1613 = vmatpush1.msra.mxu1 %v2981_v52 }
 0x503   :  { %1543 = vmatprep.subr.mxu0 %v2988_v63  ;;  %1614 = vmatprep.subr.mxu1 %v2993_v60 }
 0x504   :  { %1544 = vmatpush1.msra.mxu0 %v3000_v0  ;;  %1615 = vmatpush1.msra.mxu1 %v3005_v9 }
 0x505   :  { %1545 = vmatprep.subr.mxu0 %v3012_v31  ;;  %1616 = vmatprep.subr.mxu1 %v3017_v33 }
 0x506   :  { %1546 = vmatpush1.msra.mxu0 %v3024_v35  ;;  %1617 = vmatpush1.msra.mxu1 %v3029_v37 }
 0x507   :  { %1547 = vmatprep.subr.mxu0 %v3036_v39  ;;  %1618 = vmatprep.subr.mxu1 %v3041_v41 }
 0x508   :  { %1548 = vmatpush1.msra.mxu0 %v3048_v43  ;;  %1619 = vmatpush1.msra.mxu1 %v3053_v45 }
 0x509   :  { %1549 = vmatprep.subr.mxu0 %v3060_v47  ;;  %1620 = vmatprep.subr.mxu1 %v3065_v49 }
 0x50a   :  { %1550 = vmatpush1.msra.mxu0 %v2793_v1  ;;  %1621 = vmatpush1.msra.mxu1 %v3072_v51  ;;  %v3696_v1 = vld [vmem:[#allocation11_spill] sm:$0xff] }
 0x50b   :  { %1551 = vmatprep.subr.mxu0 %v2799_v2  ;;  %1622 = vmatprep.subr.mxu1 %v3079_v53  ;;  %v3697_v2 = vld [vmem:[#allocation18_spill] sm:$0xff] }
 0x50c   :  { %1552 = vmatpush1.msra.mxu0 %v2805_v4  ;;  %1623 = vmatpush1.msra.mxu1 %v3086_v50  ;;  %v3698_v4 = vld [vmem:[#allocation6_spill] sm:$0xff] }
 0x50d   :  { %1553 = vmatprep.subr.mxu0 %v2811_v5  ;;  %1624 = vmatprep.subr.mxu1 %v3093_v17  ;;  %v3699_v5 = vld [vmem:[#allocation12_spill] sm:$0xff] }
 0x50e   :  { %1554 = vmatpush1.msra.mxu0 %v2816_v6  ;;  %1625 = vmatpush1.msra.mxu1 %v3098_v22  ;;  %v3700_v6 = vld [vmem:[#allocation13_spill] sm:$0xff] }
 0x50f   :  { %1555 = vmatprep.subr.mxu0 %v2821_v7  ;;  %1626 = vmatprep.subr.mxu1 %v3103_v26  ;;  %v3701_v7 = vld [vmem:[#allocation19_spill] sm:$0xff] }
 0x510   :  { %1556 = vmatpush1.msra.mxu0 %v2827_v8  ;;  %1627 = vmatpush1.msra.mxu1 %v3110_v30  ;;  %v3702_v8 = vld [vmem:[#allocation7_spill] sm:$0xff] }
 0x511   :  { %1557 = vmatprep.subr.mxu0 %v2833_v10  ;;  %1628 = vmatprep.subr.mxu1 %v3117_v34  ;;  %v3703_v10 = vld [vmem:[#allocation14_spill] sm:$0xff] }
 0x512   :  { %1558 = vmatpush1.msra.mxu0 %v2839_v11  ;;  %1629 = vmatpush1.msra.mxu1 %v3124_v38  ;;  %v3704_v11 = vld [vmem:[#allocation15_spill] sm:$0xff] }
 0x513   :  { %1559 = vmatprep.subr.mxu0 %v2845_v12  ;;  %1630 = vmatprep.subr.mxu1 %v3131_v42  ;;  %v3705_v12 = vld [vmem:[#allocation20_spill] sm:$0xff] }
 0x514   :  { %1560 = vmatpush1.msra.mxu0 %v2851_v13  ;;  %1631 = vmatpush1.msra.mxu1 %v3138_v55  ;;  %v3706_v13 = vld [vmem:[#allocation8_spill] sm:$0xff] }
 0x515   :  { %1561 = vmatprep.subr.mxu0 %v2857_v14  ;;  %1632 = vmatprep.subr.mxu1 %v3145_v57  ;;  %v3707_v14 = vld [vmem:[#allocation4_spill] sm:$0xff] }
 0x516   :  { %1562 = vmatpush1.msra.mxu0 %v2863_v15  ;;  %1633 = vmatpush1.msra.mxu1 %v3152_v58  ;;  %v3708_v15 = vld [vmem:[#allocation16_spill] sm:$0xff] }
 0x517   :  { %1563 = vmatprep.subr.mxu0 %v3696_v1  ;;  %1634 = vmatprep.subr.mxu1 %v3697_v2 }
 0x518   :  { %1564 = vmatpush1.msra.mxu0 %v3698_v4  ;;  %1635 = vmatpush1.msra.mxu1 %v3699_v5  ;;  %v2006_v4 = vld [vmem:[%s3552_s0 + $0xb0] sm:$0xff] }
 0x519   :  { %1565 = vmatprep.subr.mxu0 %v3700_v6  ;;  %1636 = vmatprep.subr.mxu1 %v3701_v7 }
 0x51a   :  { %1566 = vmatpush1.msra.mxu0 %v3702_v8  ;;  %1637 = vmatpush1.msra.mxu1 %v3703_v10 }
 0x51b   :  { %1567 = vmatprep.subr.mxu0 %v3704_v11  ;;  %1638 = vmatprep.subr.mxu1 %v3705_v12 }
 0x51c   :  { %1568 = vmatpush1.msra.mxu0 %v3706_v13  ;;  %1639 = vmatpush1.msra.mxu1 %v3707_v14 }
 0x51d   :  { %1569 = vmatprep.subr.mxu0 %v3708_v15  ;;  %1640 = vmatprep.subr.mxu1 %v3709_v16 }
 0x51e   :  { %1570 = vmatpush1.msra.mxu0 %v3710_v28  ;;  %1603 = vmatprep.mubr.f32.mxu0 %v3711_v36 }
 0x51f   :  { %1641 = vmatpush1.msra.mxu1 %v3712_v21  ;;  %1674 = vmatprep.mubr.f32.mxu1 %v3711_v36 }
 0x520   :  { %1780 = vmatprep.subr.mxu0 %v3713_v32  ;;  %1851 = vmatprep.subr.mxu1 %v3714_v40 }
 0x5bf   :  { %v1364_v24 = vpop.f32.mrf.mxu0  ;;  %v1435_v25 = vpop.f32.mrf.mxu1 }
 0x5c0   :  { %v1440_v44 = vadd.f32 %v2004_v18, %v1364_v24  ;;  %v1442_v11 = vadd.f32 %v2006_v4, %v1435_v25 }
 0x5c1   :  { %v1366_v61 = vpop.f32.mrf.mxu0  ;;  %v1437_v20 = vpop.f32.mrf.mxu1 }
 0x5c2   :  { %v2008_v19 = vmul.f32 -1.442695, %v1440_v44  ;;  %v1441_v46 = vadd.f32 %v2005_v27, %v1366_v61  ;;  %v1443_v1 = vadd.f32 %v2007_v23, %v1437_v20 }
 0x5c4   :  { %2110 = vpow2.f32 %v2008_v19  ;;  %v2009_v59 = vmul.f32 -1.442695, %v1441_v46  ;;  %v2010_v6 = vmul.f32 -1.442695, %v1443_v1 }
 0x5c6   :  { %2112 = vpow2.f32 %v2009_v59 }
 0x5c7   :  { %2114 = vpow2.f32 %v2010_v6 }
 0x5d1   :  { %v2111_v8 = vpop.eup %2110 }
 0x5d2   :  { %v1447_v13 = vadd.f32 1.0, %v2111_v8 }
 0x5d3   :  { %v2113_v15 = vpop.eup %2112 }
 0x5d4   :  { %2116 = vrcp.f32 %v1447_v13  ;;  %v1453_v28 = vadd.f32 1.0, %v2113_v15  ;;  %v2115_v32 = vpop.eup %2114  ;;  %v2020_v15 = vld [vmem:[%s3552_s0 + $0xe0] sm:$0xff] }
 0x5d5   :  { %2118 = vtanh.f32 %v1442_v11  ;;  %v1460_v27 = vadd.f32 1.0, %v2115_v32  ;;  %v2021_v32 = vld [vmem:[%s3552_s0 + $0xe8] sm:$0xff] }
 0x5d6   :  { %2120 = vrcp.f32 %v1453_v28 }
 0x5d7   :  { %2122 = vrcp.f32 %v1460_v27 }
 0x5e1   :  { %v2117_v40 = vpop.eup %2116 }
 0x5e2   :  { %v2119_v18 = vpop.eup %2118 }
 0x5e3   :  { %v2121_v24 = vpop.eup %2120  ;;  %v1464_v44 = vmul.f32 %v2119_v18, %v2117_v40 }
 0x5e4   :  { %v1463_v61 = vmul.f32 %v2121_v24, %v3316_v29  ;;  %v2123_v46 = vpop.eup %2122  ;;  %v2014_v29 = vld [vmem:[%s3552_s0 + $0xd0] sm:$0xff] }
 0x5e6   :  { %v3401_v19 = vadd.f32 %v1464_v44, %v1463_v61 }
 0x5e8   :  { %2124 = vtanh.f32 %v3401_v19 }
 0x5f5   :  { %v2125_v25 = vpop.eup %2124 }
 0x5f6   :  { %v1467_v59 = vmul.f32 %v2125_v25, %v2123_v46 }
 0x5f8   :  { %2011 = vst [vmem:[%s3553_s3 + $0x28] sm:$0xff] %v1467_v59  ;;  %1604 = vmatmul.mubr.f32.vlgmr.msra.gmra.mxu0 %v1467_v59  ;;  %1675 = vmatmul.mubr.f32.vlgmr.msra.gmra.mxu1 %v1467_v59  ;;  %v2022_v59 = vld [vmem:[%s3552_s0 + $0xf0] sm:$0xff] }
 0x5f9   :  { %1781 = vmatpush1.msra.mxu0 %v2952_v54  ;;  %1852 = vmatpush1.msra.mxu1 %v2957_v56  ;;  %v1756_v54 = vld [vmem:[%s3550_s2 + $0x140] sm:$0xff]  ;;  %v1753_v56 = vld [vmem:[%s3550_s2 + $0x128] sm:$0xff] }
 0x5fa   :  { %1782 = vmatprep.subr.mxu0 %v2964_v62  ;;  %1853 = vmatprep.subr.mxu1 %v2969_v3  ;;  %v1752_v62 = vld [vmem:[%s3550_s2 + $0x120] sm:$0xff]  ;;  %v1749_v3 = vld [vmem:[%s3550_s2 + $0x108] sm:$0xff] }
 0x5fb   :  { %1783 = vmatpush1.msra.mxu0 %v2976_v48  ;;  %1854 = vmatpush1.msra.mxu1 %v2981_v52  ;;  %v1748_v48 = vld [vmem:[%s3550_s2 + $0x100] sm:$0xff]  ;;  %v1745_v52 = vld [vmem:[%s3550_s2 + $0xe8] sm:$0xff] }
 0x5fc   :  { %1784 = vmatprep.subr.mxu0 %v2988_v63  ;;  %1855 = vmatprep.subr.mxu1 %v2993_v60  ;;  %v1744_v63 = vld [vmem:[%s3550_s2 + $0xe0] sm:$0xff]  ;;  %v1741_v60 = vld [vmem:[%s3550_s2 + $0xc8] sm:$0xff] }
 0x5fd   :  { %1785 = vmatpush1.msra.mxu0 %v3000_v0  ;;  %1856 = vmatpush1.msra.mxu1 %v3005_v9  ;;  %v1740_v0 = vld [vmem:[%s3550_s2 + $0xc0] sm:$0xff]  ;;  %v1737_v9 = vld [vmem:[%s3550_s2 + $0xa8] sm:$0xff] }
 0x5fe   :  { %1786 = vmatprep.subr.mxu0 %v3012_v31  ;;  %1857 = vmatprep.subr.mxu1 %v3017_v33  ;;  %v1736_v31 = vld [vmem:[%s3550_s2 + $0xa0] sm:$0xff]  ;;  %v1733_v33 = vld [vmem:[%s3550_s2 + $0x88] sm:$0xff] }
 0x5ff   :  { %1787 = vmatpush1.msra.mxu0 %v3024_v35  ;;  %1858 = vmatpush1.msra.mxu1 %v3029_v37  ;;  %v1732_v35 = vld [vmem:[%s3550_s2 + $0x80] sm:$0xff]  ;;  %v1729_v37 = vld [vmem:[%s3550_s2 + $0x68] sm:$0xff] }
 0x600   :  { %1788 = vmatprep.subr.mxu0 %v3036_v39  ;;  %1859 = vmatprep.subr.mxu1 %v3041_v41  ;;  %v1728_v39 = vld [vmem:[%s3550_s2 + $0x60] sm:$0xff]  ;;  %v1725_v41 = vld [vmem:[%s3550_s2 + $0x48] sm:$0xff] }
 0x601   :  { %1789 = vmatpush1.msra.mxu0 %v3048_v43  ;;  %1860 = vmatpush1.msra.mxu1 %v3053_v45  ;;  %v1724_v43 = vld [vmem:[%s3550_s2 + $0x40] sm:$0xff]  ;;  %v1721_v45 = vld [vmem:[%s3550_s2 + $0x28] sm:$0xff] }
 0x602   :  { %1790 = vmatprep.subr.mxu0 %v3060_v47  ;;  %1861 = vmatprep.subr.mxu1 %v3065_v49  ;;  %v1720_v47 = vld [vmem:[%s3550_s2 + $0x20] sm:$0xff]  ;;  %v1717_v49 = vld [vmem:[%s3550_s2 + $0x8] sm:$0xff] }
 0x603   :  { %1862 = vmatpush1.msra.mxu1 %v3072_v51  ;;  %1844 = vmatprep.mubr.f32.mxu0 %v3711_v36  ;;  %v1716_v51 = vld [vmem:[%s3550_s2] sm:$0xff] }
 0x604   :  { %1863 = vmatprep.subr.mxu1 %v3079_v53  ;;  %1915 = vmatprep.mubr.f32.mxu1 %v3711_v36  ;;  %v2012_v53 = vld [vmem:[%s3552_s0 + $0xc0] sm:$0xff] }
 0x605   :  { %1864 = vmatpush1.msra.mxu1 %v3086_v50  ;;  %1791 = vmatpush1.msra.mxu0 %v1756_v54 }
 0x606   :  { %1865 = vmatprep.subr.mxu1 %v3093_v17  ;;  %1792 = vmatprep.subr.mxu0 %v1753_v56  ;;  %v2013_v17 = vld [vmem:[%s3552_s0 + $0xc8] sm:$0xff] }
 0x607   :  { %1866 = vmatpush1.msra.mxu1 %v3098_v22  ;;  %1793 = vmatpush1.msra.mxu0 %v1752_v62 }
 0x608   :  { %1867 = vmatprep.subr.mxu1 %v3103_v26  ;;  %1794 = vmatprep.subr.mxu0 %v1749_v3 }
 0x609   :  { %1868 = vmatpush1.msra.mxu1 %v3110_v30  ;;  %1795 = vmatpush1.msra.mxu0 %v1748_v48 }
 0x60a   :  { %1869 = vmatprep.subr.mxu1 %v3117_v34  ;;  %1796 = vmatprep.subr.mxu0 %v1745_v52 }
 0x60b   :  { %1870 = vmatpush1.msra.mxu1 %v3124_v38  ;;  %1797 = vmatpush1.msra.mxu0 %v1744_v63 }
 0x60c   :  { %1871 = vmatprep.subr.mxu1 %v3131_v42  ;;  %1798 = vmatprep.subr.mxu0 %v1741_v60 }
 0x60d   :  { %1872 = vmatpush1.msra.mxu1 %v3138_v55  ;;  %1799 = vmatpush1.msra.mxu0 %v1740_v0  ;;  %v2015_v55 = vld [vmem:[%s3552_s0 + $0xd8] sm:$0xff] }
 0x60e   :  { %1873 = vmatprep.subr.mxu1 %v3145_v57  ;;  %1800 = vmatprep.subr.mxu0 %v1737_v9 }
 0x60f   :  { %1874 = vmatpush1.msra.mxu1 %v3152_v58  ;;  %1801 = vmatpush1.msra.mxu0 %v1736_v31 }
 0x610   :  { %1875 = vmatprep.subr.mxu1 %v3697_v2  ;;  %1802 = vmatprep.subr.mxu0 %v1733_v33 }
 0x611   :  { %1876 = vmatpush1.msra.mxu1 %v3699_v5  ;;  %1803 = vmatpush1.msra.mxu0 %v1732_v35 }
 0x612   :  { %1877 = vmatprep.subr.mxu1 %v3701_v7  ;;  %1804 = vmatprep.subr.mxu0 %v1729_v37 }
 0x613   :  { %1878 = vmatpush1.msra.mxu1 %v3703_v10  ;;  %1805 = vmatpush1.msra.mxu0 %v1728_v39 }
 0x614   :  { %1879 = vmatprep.subr.mxu1 %v3705_v12  ;;  %1806 = vmatprep.subr.mxu0 %v1725_v41 }
 0x615   :  { %1880 = vmatpush1.msra.mxu1 %v3707_v14  ;;  %1807 = vmatpush1.msra.mxu0 %v1724_v43 }
 0x616   :  { %1881 = vmatprep.subr.mxu1 %v3709_v16  ;;  %1808 = vmatprep.subr.mxu0 %v1721_v45 }
 0x617   :  { %1882 = vmatpush1.msra.mxu1 %v3712_v21  ;;  %1809 = vmatpush1.msra.mxu0 %v1720_v47 }
 0x618   :  { %1810 = vmatprep.subr.mxu0 %v1717_v49 }
 0x619   :  { %1811 = vmatpush1.msra.mxu0 %v1716_v51 }
 0x6b8   :  { %v1605_v50 = vpop.f32.mrf.mxu0  ;;  %v1676_v38 = vpop.f32.mrf.mxu1 }
 0x6b9   :  { %v1681_v22 = vadd.f32 %v2012_v53, %v1605_v50  ;;  %v1683_v7 = vadd.f32 %v2014_v29, %v1676_v38 }
 0x6ba   :  { %v1607_v26 = vpop.f32.mrf.mxu0  ;;  %v1678_v57 = vpop.f32.mrf.mxu1 }
 0x6bb   :  { %v2016_v30 = vmul.f32 -1.442695, %v1681_v22  ;;  %v1682_v34 = vadd.f32 %v2013_v17, %v1607_v26  ;;  %v1684_v58 = vadd.f32 %v2015_v55, %v1678_v57 }
 0x6bd   :  { %2126 = vpow2.f32 %v2016_v30  ;;  %v2017_v42 = vmul.f32 -1.442695, %v1682_v34  ;;  %v2018_v2 = vmul.f32 -1.442695, %v1684_v58 }
 0x6bf   :  { %2128 = vpow2.f32 %v2017_v42 }
 0x6c0   :  { %2130 = vpow2.f32 %v2018_v2 }
 0x6ca   :  { %v2127_v5 = vpop.eup %2126 }
 0x6cb   :  { %v1688_v10 = vadd.f32 1.0, %v2127_v5 }
 0x6cc   :  { %v2129_v12 = vpop.eup %2128 }
 0x6cd   :  { %2132 = vrcp.f32 %v1688_v10  ;;  %v1694_v14 = vadd.f32 1.0, %v2129_v12  ;;  %v2131_v16 = vpop.eup %2130 }
 0x6ce   :  { %2134 = vtanh.f32 %v1683_v7  ;;  %v1701_v20 = vadd.f32 1.0, %v2131_v16 }
 0x6cf   :  { %2136 = vrcp.f32 %v1694_v14 }
 0x6d0   :  { %2138 = vrcp.f32 %v1701_v20 }
 0x6da   :  { %v2133_v36 = vpop.eup %2132 }
 0x6db   :  { %v2135_v21 = vpop.eup %2134 }
 0x6dc   :  { %v2137_v23 = vpop.eup %2136  ;;  %v1705_v1 = vmul.f32 %v2135_v21, %v2133_v36 }
 0x6dd   :  { %v1704_v4 = vmul.f32 %v2137_v23, %v3401_v19  ;;  %v2139_v8 = vpop.eup %2138  ;;  %v2023_v19 = vld [vmem:[%s3552_s0 + $0xf8] sm:$0xff] }
 0x6df   :  { %v1706_v6 = vadd.f32 %v1705_v1, %v1704_v4 }
 0x6e1   :  { %2140 = vtanh.f32 %v1706_v6 }
 0x6ee   :  { %v2141_v11 = vpop.eup %2140 }
 0x6ef   :  { %v1708_v13 = vmul.f32 %v2141_v11, %v2139_v8 }
 0x6f1   :  { %2019 = vst [vmem:[%s3553_s3 + $0x30] sm:$0xff] %v1708_v13  ;;  %1845 = vmatmul.mubr.f32.vlgmr.msra.gmra.mxu0 %v1708_v13  ;;  %1916 = vmatmul.mubr.f32.vlgmr.msra.gmra.mxu1 %v1708_v13 }
 0x7b1   :  { %v1846_v28 = vpop.f32.mrf.mxu0  ;;  %v1917_v44 = vpop.f32.mrf.mxu1 }
 0x7b2   :  { %v1922_v40 = vadd.f32 %v2020_v15, %v1846_v28  ;;  %v1924_v62 = vadd.f32 %v2022_v59, %v1917_v44 }
 0x7b3   :  { %v1848_v18 = vpop.f32.mrf.mxu0  ;;  %v1919_v46 = vpop.f32.mrf.mxu1 }
 0x7b4   :  { %v2024_v24 = vmul.f32 -1.442695, %v1922_v40  ;;  %v1923_v27 = vadd.f32 %v2021_v32, %v1848_v18  ;;  %v1925_v25 = vadd.f32 %v2023_v19, %v1919_v46 }
 0x7b6   :  { %2142 = vpow2.f32 %v2024_v24  ;;  %v2025_v61 = vmul.f32 -1.442695, %v1923_v27  ;;  %v2026_v54 = vmul.f32 -1.442695, %v1925_v25 }
 0x7b8   :  { %2144 = vpow2.f32 %v2025_v61 }
 0x7b9   :  { %2146 = vpow2.f32 %v2026_v54 }
 0x7c3   :  { %v2143_v56 = vpop.eup %2142 }
 0x7c4   :  { %v1929_v3 = vadd.f32 1.0, %v2143_v56 }
 0x7c5   :  { %v2145_v48 = vpop.eup %2144 }
 0x7c6   :  { %2148 = vrcp.f32 %v1929_v3  ;;  %v1935_v52 = vadd.f32 1.0, %v2145_v48  ;;  %v2147_v63 = vpop.eup %2146 }
 0x7c7   :  { %2150 = vtanh.f32 %v1924_v62  ;;  %v1942_v31 = vadd.f32 1.0, %v2147_v63 }
 0x7c8   :  { %2152 = vrcp.f32 %v1935_v52 }
 0x7c9   :  { %2154 = vrcp.f32 %v1942_v31 }
 0x7d3   :  { %v2149_v60 = vpop.eup %2148 }
 0x7d4   :  { %v2151_v0 = vpop.eup %2150 }
 0x7d5   :  { %v2153_v9 = vpop.eup %2152  ;;  %v1946_v33 = vmul.f32 %v2151_v0, %v2149_v60 }
 0x7d6   :  { %v1945_v35 = vmul.f32 %v2153_v9, %v1706_v6  ;;  %v2155_v39 = vpop.eup %2154 }
 0x7d8   :  { %v1947_v37 = vadd.f32 %v1946_v33, %v1945_v35 }
 0x7da   :  { %2156 = vtanh.f32 %v1947_v37  ;;  %1960 = vst [vmem:[%s3554_s4 + $0x8] sm:$0xff] %v1947_v37 }
 0x7e7   :  { %v2157_v41 = vpop.eup %2156 }
 0x7e8   :  { %v1949_v43 = vmul.f32 %v2157_v41, %v2155_v39 }
 0x7ea   :  { %2027 = vst [vmem:[%s3553_s3 + $0x38] sm:$0xff] %v1949_v43  ;;  %v2028_v45 = vclamps-f32 %v1949_v43, 20.0 }
 0x7ec   :  { %1959 = vst [vmem:[%s3554_s4] sm:$0xff] %v2028_v45 }

</bundles_post_ra>
